<compile_context>
chip_gen: v6e
topology: v6e:2x2x1
jax: 0.10.0
libtpu: 0.0.40
codegen_flags: <defaults>
</compile_context>

<pallas_src>
import numpy as np

import jax
import jax.numpy as jnp
from jax import lax
from jax.experimental import pallas as pl
from jax.experimental.pallas import tpu as pltpu


# ----------------------------------------------------------------------------
# Host-side (one-time) weight preprocessing: torch layouts -> packed matmul
# operands with the whole (seq, width, channel) contraction folded in.
# ----------------------------------------------------------------------------
def _nchw_flatten_perm(nx, c):
    """perm[w*c + ci] = ci*nx + w  (our (w, c) column order <-> torch NCHW flatten)."""
    w_idx, c_idx = np.meshgrid(np.arange(nx), np.arange(c), indexing="ij")
    return (c_idx * nx + w_idx).reshape(-1)


def _conv_matrix(w_eq, hin, win, cin, full):
    """Full block-Toeplitz matrix for a stride-1 2-D (transposed-)convolution.

    w_eq: (KH, KW, Cin, Cout) correlation weight (already flipped for transposed
    convs).  Activations are flattened as column index (h*Win + w)*Cin + c.
    full=True implements the "full" correlation == stride-1 ConvTranspose2d.
    Returns (M, hout, wout) with M of shape (hin*win*cin, hout*wout*cout).
    """
    w = np.asarray(w_eq, np.float32)
    KH, KW, Cin, Cout = w.shape
    assert Cin == cin
    ph = KH - 1 if full else 0
    pw = KW - 1 if full else 0
    hout = hin - KH + 1 + 2 * ph
    wout = win - KW + 1 + 2 * pw
    M = np.zeros((hin * win * Cin, hout * wout * Cout), np.float32)
    for ho in range(hout):
        for wo in range(wout):
            for kh in range(KH):
                for kw in range(KW):
                    hi, wi = ho + kh - ph, wo + kw - pw
                    if 0 <= hi < hin and 0 <= wi < win:
                        r0 = (hi * win + wi) * Cin
                        c0 = (ho * wout + wo) * Cout
                        M[r0:r0 + Cin, c0:c0 + Cout] += w[kh, kw]
    return M, hout, wout


def _conv_bias(b, hout, wout):
    """Bias tiled to the (h*wout + w)*Cout + c flattened column layout."""
    return np.tile(np.asarray(b, np.float32), hout * wout)


def _deconv_eq_weight(w_pt):
    """torch ConvTranspose2d weight (Cin, Cout, KH, KW) -> equivalent
    correlation weight (KH, KW, Cin, Cout) (spatially flipped)."""
    w = np.asarray(w_pt, np.float32)
    return np.flip(w, axis=(2, 3)).transpose(2, 3, 0, 1)


def prepare_params(p, embed_dim, latent_dim, seq_size, weight_dtype=jnp.bfloat16):
    """One-time conversion (call OUTSIDE jit) of torch-layout parameters into the
    4 packed operands consumed by the fused kernel."""
    assert seq_size == 7, "encoder needs seq_size == 7 (three valid 3x3 convs -> seq axis 1)"
    E, L, S = embed_dim, latent_dim, seq_size
    nx = E - 6
    assert nx >= 1, "embed_dim must be > 6"
    perm = _nchw_flatten_perm(nx, 16)

    # ---- encoder: three valid (3,3) convs + fc ----
    m_e1, h1, w1 = _conv_matrix(p["enc_c1_w"], S, E, 1, full=False)
    b_e1 = _conv_bias(p["enc_c1_b"], h1, w1)
    m_e2, h2, w2 = _conv_matrix(p["enc_c2_w"], h1, w1, 4, full=False)
    b_e2 = _conv_bias(p["enc_c2_b"], h2, w2)
    m_e3, h3, w3 = _conv_matrix(p["enc_c3_w"], h2, w2, 8, full=False)
    b_e3 = _conv_bias(p["enc_c3_b"], h3, w3)
    assert (h3, w3) == (1, nx)

    m_efc = np.asarray(p["enc_fc_w"], np.float32)[perm, :]          # (16*nx, 2L)
    b_efc = np.asarray(p["enc_fc_b"], np.float32)

    # ---- both decoder fcs fused into one matrix: [mirror | answer] ----
    m_dfc = np.concatenate(
        [np.asarray(p["dm_fc_w"], np.float32)[:, perm],
         np.asarray(p["da_fc_w"], np.float32)[:, perm]], axis=1)    # (L, 2*16*nx)
    b_dfc = np.concatenate([np.asarray(p["dm_fc_b"], np.float32)[perm],
                            np.asarray(p["da_fc_b"], np.float32)[perm]])

    # ---- decoder_mirror: three (3,3) transposed convs ----
    m_m3, mh3, mw3 = _conv_matrix(_deconv_eq_weight(p["dm_c3_w"]), 1, nx, 16, full=True)
    b_m3 = _conv_bias(p["dm_c3_b"], mh3, mw3)
    m_m2, mh2, mw2 = _conv_matrix(_deconv_eq_weight(p["dm_c2_w"]), mh3, mw3, 8, full=True)
    b_m2 = _conv_bias(p["dm_c2_b"], mh2, mw2)
    m_m1, mh1, mw1 = _conv_matrix(_deconv_eq_weight(p["dm_c1_w"]), mh2, mw2, 4, full=True)
    b_m1 = _conv_bias(p["dm_c1_b"], mh1, mw1)
    assert (mh1, mw1) == (S, E)

    # ---- decoder_answer: three (1,3) transposed convs ----
    m_a3, ah3, aw3 = _conv_matrix(_deconv_eq_weight(p["da_c3_w"]), 1, nx, 16, full=True)
    b_a3 = _conv_bias(p["da_c3_b"], ah3, aw3)
    m_a2, ah2, aw2 = _conv_matrix(_deconv_eq_weight(p["da_c2_w"]), ah3, aw3, 8, full=True)
    b_a2 = _conv_bias(p["da_c2_b"], ah2, aw2)
    m_a1, ah1, aw1 = _conv_matrix(_deconv_eq_weight(p["da_c1_w"]), ah2, aw2, 4, full=True)
    b_a1 = _conv_bias(p["da_c1_b"], ah1, aw1)
    assert (ah1, aw1) == (1, E)

    a_mats = [m_e1, m_e2, m_e3, m_m3, m_m2, m_m1]      # "big" layers
    b_mats = [m_efc, m_a3, m_a2, m_a1]                 # "small" layers
    biases = [b_e1, b_e2, b_e3, b_efc, b_dfc, b_m3, b_m2, b_m1, b_a3, b_a2, b_a1]

    pa = max(max(m.shape) for m in a_mats)
    pb = max(max(m.shape) for m in b_mats)
    bw = max(b.shape[0] for b in biases)

    w_a = np.zeros((len(a_mats), pa, pa), np.float32)
    for i, m in enumerate(a_mats):
        w_a[i, :m.shape[0], :m.shape[1]] = m
    w_b = np.zeros((len(b_mats), pb, pb), np.float32)
    for i, m in enumerate(b_mats):
        w_b[i, :m.shape[0], :m.shape[1]] = m
    bias = np.zeros((len(biases), bw), np.float32)
    for i, b in enumerate(biases):
        bias[i, :b.shape[0]] = b

    return {
        "wA": jnp.asarray(w_a, weight_dtype),
        "wB": jnp.asarray(w_b, weight_dtype),
        "wfc": jnp.asarray(m_dfc, weight_dtype),
        "bias": jnp.asarray(bias, jnp.float32),          # f32 bias / epilogue
    }


# ----------------------------------------------------------------------------
# Fused Pallas kernel (single program, everything resident in VMEM)
# ----------------------------------------------------------------------------
def _make_kernel(dims):
    (SE, E, L, nx, N1, N2, N3, NM3, NM2, NA3, NA2, OUTW) = dims
    FCN = 16 * nx                       # width of each decoder-fc output
    used = SE + E + 3 * L               # columns actually used in the output slab

    def kernel(xin_ref, wA_ref, wB_ref, wfc_ref, b_ref, out_ref):
        f32 = jnp.float32
        wdt = wA_ref.dtype              # bf16 (or f32) matmul operand dtype

        def lay(h, w, brow, n, relu=True):
            # one whole (transposed-)conv / fc layer == one MXU matmul
            y = jnp.dot(h.astype(wdt), w, preferred_element_type=f32)
            y = y + b_ref[brow:brow + 1, :n]            # f32 bias epilogue
            return jnp.maximum(y, 0.0) if relu else y

        x = xin_ref[:, :SE]                             # (Bp, S*E)  f32
        eps = xin_ref[:, SE:SE + L]                     # (Bp, L)    f32

        # -------- encoder: 3 valid (3,3) convs + fc, one matmul each --------
        h = lay(x, wA_ref[0, :SE, :N1], 0, N1)
        h = lay(h, wA_ref[1, :N1, :N2], 1, N2)
        h = lay(h, wA_ref[2, :N2, :N3], 2, N3)
        ml = lay(h, wB_ref[0, :N3, :2 * L], 3, 2 * L, relu=False)   # [mean|logvar]
        mean, logvar = ml[:, :L], ml[:, L:2 * L]
        z = mean + eps * jnp.exp(0.5 * logvar)          # reparameterization sampler

        # -------- both decoder fcs fused into a single dot --------
        d0 = lay(z, wfc_ref[...], 4, 2 * FCN)           # (Bp, 2*16*nx)
        hm, ha = d0[:, :FCN], d0[:, FCN:2 * FCN]

        # -------- decoder_mirror: 3 (3,3) transposed convs --------
        hm = lay(hm, wA_ref[3, :N3, :NM3], 5, NM3)
        hm = lay(hm, wA_ref[4, :NM3, :NM2], 6, NM2)
        recon = lay(hm, wA_ref[5, :NM2, :SE], 7, SE)    # torch ReLUs the last deconv too

        # -------- decoder_answer: 3 (1,3) transposed convs --------
        ha = lay(ha, wB_ref[1, :N3, :NA3], 8, NA3)
        ha = lay(ha, wB_ref[2, :NA3, :NA2], 9, NA2)
        ans = lay(ha, wB_ref[3, :NA2, :E], 10, E)

        # -------- single lane-dense merged output slab --------
        out_ref[:, :SE] = recon
        out_ref[:, SE:SE + E] = ans
        out_ref[:, SE + E:SE + E + L] = mean
        out_ref[:, SE + E + L:SE + E + 2 * L] = logvar
        out_ref[:, SE + E + 2 * L:used] = z
        if OUTW > used:
            out_ref[:, used:] = jnp.zeros((out_ref.shape[0], OUTW - used), f32)

    return kernel


# ----------------------------------------------------------------------------
# Wrapper
# ----------------------------------------------------------------------------
def vae_forward(prepped, x, eps):
    """x: (B, seq_size, embed_dim) f32, eps: (B, latent_dim) f32.  B must be >= 2
    so torch's trailing .squeeze() only removes the singleton channel/seq dims."""
    B, S, E = x.shape
    L = eps.shape[1]
    assert S == 7, "encoder needs seq_size == 7"
    nx = E - 6
    SE = S * E

    # per-layer exact (K, N) dims, derived statically from the shapes
    N1 = 5 * (E - 2) * 4
    N2 = 3 * (E - 4) * 8
    N3 = 16 * nx
    NM3 = 3 * (nx + 2) * 8
    NM2 = 5 * (nx + 4) * 4
    NA3 = (nx + 2) * 8
    NA2 = (nx + 4) * 4

    Bp = max(8, ((B + 7) // 8) * 8)                 # pad batch to sublane height
    INW = ((SE + L + 127) // 128) * 128             # lane-dense packed input
    used = SE + E + 3 * L
    OUTW = ((used + 127) // 128) * 128              # lane-dense merged output

    xin = jnp.zeros((Bp, INW), jnp.float32)
    xin = xin.at[:B, :SE].set(x.reshape(B, SE).astype(jnp.float32))
    xin = xin.at[:B, SE:SE + L].set(eps.astype(jnp.float32))

    kernel = _make_kernel((SE, E, L, nx, N1, N2, N3, NM3, NM2, NA3, NA2, OUTW))
    vmem = pl.BlockSpec(memory_space=pltpu.MemorySpace.VMEM)

    out = pl.pallas_call(
        kernel,
        out_shape=jax.ShapeDtypeStruct((Bp, OUTW), jnp.float32),
        in_specs=[vmem, vmem, vmem, vmem, vmem],
        out_specs=vmem,
    )(xin, prepped["wA"], prepped["wB"], prepped["wfc"], prepped["bias"])

    return {
        "recon_input": out[:B, :SE].reshape(B, S, E),
        "output": out[:B, SE:SE + E],
        "mean": out[:B, SE + E:SE + E + L],
        "logvar": out[:B, SE + E + L:SE + E + 2 * L],
        "latent_vec": out[:B, SE + E + 2 * L:used],
    }


# ----------------------------------------------------------------------------
# Parameters (random, torch-equivalent layouts) and plain-JAX reference
# ----------------------------------------------------------------------------
def init_params(key, embed_dim, latent_dim):
    nx = embed_dim - 6
    ks = iter(jax.random.split(key, 32))

    def w(shape, scale=0.05):
        return jax.random.normal(next(ks), shape, jnp.float32) * scale

    p = {}
    # encoder convs, stored as (KH, KW, Cin, Cout)
    p["enc_c1_w"] = w((3, 3, 1, 4));   p["enc_c1_b"] = w((4,))
    p["enc_c2_w"] = w((3, 3, 4, 8));   p["enc_c2_b"] = w((8,))
    p["enc_c3_w"] = w((3, 3, 8, 16));  p["enc_c3_b"] = w((16,))
    # encoder fc: Linear(nx*16 -> 2*latent_dim), stored (in, out)
    p["enc_fc_w"] = w((nx * 16, 2 * latent_dim)); p["enc_fc_b"] = w((2 * latent_dim,))

    # decoder_answer (ConvTranspose2d weights stored torch-style (Cin, Cout, KH, KW))
    p["da_fc_w"] = w((latent_dim, nx * 16)); p["da_fc_b"] = w((nx * 16,))
    p["da_c3_w"] = w((16, 8, 1, 3));  p["da_c3_b"] = w((8,))
    p["da_c2_w"] = w((8, 4, 1, 3));   p["da_c2_b"] = w((4,))
    p["da_c1_w"] = w((4, 1, 1, 3));   p["da_c1_b"] = w((1,))

    # decoder_mirror
    p["dm_fc_w"] = w((latent_dim, nx * 16)); p["dm_fc_b"] = w((nx * 16,))
    p["dm_c3_w"] = w((16, 8, 3, 3));  p["dm_c3_b"] = w((8,))
    p["dm_c2_w"] = w((8, 4, 3, 3));   p["dm_c2_b"] = w((4,))
    p["dm_c1_w"] = w((4, 1, 3, 3));   p["dm_c1_b"] = w((1,))
    return p


def _reference_forward(params, x, eps, latent_dim):
    """Plain-JAX/XLA reference of the same forward pass (self-check only)."""
    B, S, E = x.shape
    nx = E - 6
    hp = lax.Precision.HIGHEST

    def conv(h, w_eq, b):                                  # valid conv, stride 1, NHWC
        KH, KW, _, cout = w_eq.shape
        Ho, Wo = h.shape[1] - KH + 1, h.shape[2] - KW + 1
        y = jnp.zeros((B, Ho, Wo, cout), jnp.float32) + b
        for kh in range(KH):
            for kw in range(KW):
                y = y + jnp.einsum("bhwc,cd->bhwd",
                                   h[:, kh:kh + Ho, kw:kw + Wo, :], w_eq[kh, kw],
                                   precision=hp)
        return y

    def deconv(h, w_pt, b):                                # ConvTranspose2d, stride 1
        _, _, KH, KW = w_pt.shape
        w_eq = jnp.flip(w_pt, axis=(2, 3)).transpose(2, 3, 0, 1)
        h = jnp.pad(h, ((0, 0), (KH - 1, KH - 1), (KW - 1, KW - 1), (0, 0)))
        return conv(h, w_eq, b)

    h = x.reshape(B, 1, S, E).transpose(0, 2, 3, 1)        # NCHW view -> NHWC
    h = jnp.maximum(conv(h, params["enc_c1_w"], params["enc_c1_b"]), 0.0)
    h = jnp.maximum(conv(h, params["enc_c2_w"], params["enc_c2_b"]), 0.0)
    h = jnp.maximum(conv(h, params["enc_c3_w"], params["enc_c3_b"]), 0.0)
    h = h.transpose(0, 3, 1, 2).reshape(B, -1)             # torch NCHW flatten
    lat = jnp.dot(h, params["enc_fc_w"], precision=hp) + params["enc_fc_b"]
    mean, logvar = lat[:, :latent_dim], lat[:, latent_dim:]
    z = mean + eps * jnp.exp(0.5 * logvar)

    def decode(pfx):
        d = jnp.maximum(jnp.dot(z, params[pfx + "_fc_w"], precision=hp)
                        + params[pfx + "_fc_b"], 0.0)
        d = d.reshape(B, 16, 1, nx).transpose(0, 2, 3, 1)  # NCHW view -> NHWC
        d = jnp.maximum(deconv(d, params[pfx + "_c3_w"], params[pfx + "_c3_b"]), 0.0)
        d = jnp.maximum(deconv(d, params[pfx + "_c2_w"], params[pfx + "_c2_b"]), 0.0)
        d = jnp.maximum(deconv(d, params[pfx + "_c1_w"], params[pfx + "_c1_b"]), 0.0)
        return jnp.squeeze(d.transpose(0, 3, 1, 2))        # NCHW, torch .squeeze()

    return {"recon_input": decode("dm"), "output": decode("da"),
            "latent_vec": z, "mean": mean, "logvar": logvar}


# ----------------------------------------------------------------------------
if __name__ == "__main__":
    embed_dim, latent_dim, seq_size, batch = 16, 8, 7, 2   # seq_size must be 7
    assert batch >= 2  # torch .squeeze() would also drop the batch axis at batch==1

    key = jax.random.PRNGKey(0)
    k_params, k_x, k_eps = jax.random.split(key, 3)
    params = init_params(k_params, embed_dim, latent_dim)
    x = jax.random.normal(k_x, (batch, seq_size, embed_dim), jnp.float32)
    eps = jax.random.normal(k_eps, (batch, latent_dim), jnp.float32)

    ref = _reference_forward(params, x, eps, latent_dim)
    fwd = jax.jit(vae_forward)

    # f32 path checked tightly; bf16 (default fast path) checked with a looser
    # atol to absorb the expected ~1% bf16-MXU-operand drift vs the f32 module.
    for weight_dtype, rtol, atol in ((jnp.float32, 5e-2, 1e-3),
                                     (jnp.bfloat16, 5e-2, 1e-2)):
        prepped = prepare_params(params, embed_dim, latent_dim, seq_size,
                                 weight_dtype=weight_dtype)
        out = jax.block_until_ready(fwd(prepped, x, eps))

        assert out["recon_input"].shape == (batch, seq_size, embed_dim)
        assert out["output"].shape == (batch, embed_dim)
        assert out["latent_vec"].shape == (batch, latent_dim)
        assert out["mean"].shape == (batch, latent_dim)
        assert out["logvar"].shape == (batch, latent_dim)

        for k in ("recon_input", "output", "latent_vec", "mean", "logvar"):
            np.testing.assert_allclose(np.asarray(out[k]), np.asarray(ref[k]),
                                       rtol=rtol, atol=atol)

    print("KERNEL_OK")
</pallas_src>

<mosaic_0001>
module attributes {stable_mosaic.version = 11 : i64} {
  func.func @kernel(%arg0: memref<8x128xf32, #tpu.memory_space<vmem>>, %arg1: memref<6x288x288xf32, #tpu.memory_space<vmem>>, %arg2: memref<4x160x160xf32, #tpu.memory_space<vmem>>, %arg3: memref<8x320xf32, #tpu.memory_space<vmem>>, %arg4: memref<11x320xf32, #tpu.memory_space<vmem>>, %arg5: memref<8x256xf32, #tpu.memory_space<vmem>>) attributes {dimension_semantics = [], scalar_prefetch = 0 : i64, scratch_operands = 0 : i64, tpu.core_type = #tpu.core_type<tc>} {
    %c0 = arith.constant 0 : index
    %c0_0 = arith.constant 0 : index
    %0 = vector.load %arg0[%c0, %c0_0] : memref<8x128xf32, #tpu.memory_space<vmem>>, vector<8x112xf32>
    %c0_1 = arith.constant 0 : index
    %c112 = arith.constant 112 : index
    %1 = vector.load %arg0[%c0_1, %c112] : memref<8x128xf32, #tpu.memory_space<vmem>>, vector<8x8xf32>
    %c0_2 = arith.constant 0 : index
    %c0_3 = arith.constant 0 : index
    %c0_4 = arith.constant 0 : index
    %2 = vector.load %arg1[%c0_2, %c0_3, %c0_4] : memref<6x288x288xf32, #tpu.memory_space<vmem>>, vector<1x112x280xf32>
    %3 = vector.shape_cast %2 : vector<1x112x280xf32> to vector<112x280xf32>
    %cst = arith.constant dense<0.000000e+00> : vector<8x280xf32>
    %4 = tpu.matmul %0, %3, %cst {dimension_numbers = #tpu.dot_dimension_numbers<[1], [0], [0], [1], [0, 0, 1, 1], [], []>} : vector<8x112xf32>, vector<112x280xf32>, vector<8x280xf32> -> vector<8x280xf32>
    %c0_5 = arith.constant 0 : index
    %c0_6 = arith.constant 0 : index
    %5 = vector.load %arg4[%c0_5, %c0_6] : memref<11x320xf32, #tpu.memory_space<vmem>>, vector<1x280xf32>
    %6 = vector.broadcast %5 : vector<1x280xf32> to vector<8x280xf32>
    %7 = arith.addf %4, %6 : vector<8x280xf32>
    %cst_7 = arith.constant 0.000000e+00 : f32
    %8 = vector.broadcast %cst_7 : f32 to vector<8x280xf32>
    %9 = arith.maximumf %7, %8 : vector<8x280xf32>
    %c1 = arith.constant 1 : index
    %c0_8 = arith.constant 0 : index
    %c0_9 = arith.constant 0 : index
    %10 = vector.load %arg1[%c1, %c0_8, %c0_9] : memref<6x288x288xf32, #tpu.memory_space<vmem>>, vector<1x280x288xf32>
    %11 = vector.shape_cast %10 : vector<1x280x288xf32> to vector<280x288xf32>
    %cst_10 = arith.constant dense<0.000000e+00> : vector<8x288xf32>
    %12 = tpu.matmul %9, %11, %cst_10 {dimension_numbers = #tpu.dot_dimension_numbers<[1], [0], [0], [1], [0, 0, 1, 1], [], []>} : vector<8x280xf32>, vector<280x288xf32>, vector<8x288xf32> -> vector<8x288xf32>
    %c1_11 = arith.constant 1 : index
    %c0_12 = arith.constant 0 : index
    %13 = vector.load %arg4[%c1_11, %c0_12] : memref<11x320xf32, #tpu.memory_space<vmem>>, vector<1x288xf32>
    %14 = vector.broadcast %13 : vector<1x288xf32> to vector<8x288xf32>
    %15 = arith.addf %12, %14 : vector<8x288xf32>
    %cst_13 = arith.constant 0.000000e+00 : f32
    %16 = vector.broadcast %cst_13 : f32 to vector<8x288xf32>
    %17 = arith.maximumf %15, %16 : vector<8x288xf32>
    %c2 = arith.constant 2 : index
    %c0_14 = arith.constant 0 : index
    %c0_15 = arith.constant 0 : index
    %18 = vector.load %arg1[%c2, %c0_14, %c0_15] : memref<6x288x288xf32, #tpu.memory_space<vmem>>, vector<1x288x160xf32>
    %19 = vector.shape_cast %18 : vector<1x288x160xf32> to vector<288x160xf32>
    %cst_16 = arith.constant dense<0.000000e+00> : vector<8x160xf32>
    %20 = tpu.matmul %17, %19, %cst_16 {dimension_numbers = #tpu.dot_dimension_numbers<[1], [0], [0], [1], [0, 0, 1, 1], [], []>} : vector<8x288xf32>, vector<288x160xf32>, vector<8x160xf32> -> vector<8x160xf32>
    %c2_17 = arith.constant 2 : index
    %c0_18 = arith.constant 0 : index
    %21 = vector.load %arg4[%c2_17, %c0_18] : memref<11x320xf32, #tpu.memory_space<vmem>>, vector<1x160xf32>
    %22 = vector.broadcast %21 : vector<1x160xf32> to vector<8x160xf32>
    %23 = arith.addf %20, %22 : vector<8x160xf32>
    %cst_19 = arith.constant 0.000000e+00 : f32
    %24 = vector.broadcast %cst_19 : f32 to vector<8x160xf32>
    %25 = arith.maximumf %23, %24 : vector<8x160xf32>
    %c0_20 = arith.constant 0 : index
    %c0_21 = arith.constant 0 : index
    %c0_22 = arith.constant 0 : index
    %26 = vector.load %arg2[%c0_20, %c0_21, %c0_22] : memref<4x160x160xf32, #tpu.memory_space<vmem>>, vector<1x160x16xf32>
    %27 = vector.shape_cast %26 : vector<1x160x16xf32> to vector<160x16xf32>
    %cst_23 = arith.constant dense<0.000000e+00> : vector<8x16xf32>
    %28 = tpu.matmul %25, %27, %cst_23 {dimension_numbers = #tpu.dot_dimension_numbers<[1], [0], [0], [1], [0, 0, 1, 1], [], []>} : vector<8x160xf32>, vector<160x16xf32>, vector<8x16xf32> -> vector<8x16xf32>
    %c3 = arith.constant 3 : index
    %c0_24 = arith.constant 0 : index
    %29 = vector.load %arg4[%c3, %c0_24] : memref<11x320xf32, #tpu.memory_space<vmem>>, vector<1x16xf32>
    %30 = vector.broadcast %29 : vector<1x16xf32> to vector<8x16xf32>
    %31 = arith.addf %28, %30 : vector<8x16xf32>
    %32 = vector.extract_strided_slice %31 {offsets = [0, 0], sizes = [8, 8], strides = [1, 1]} : vector<8x16xf32> to vector<8x8xf32>
    %33 = vector.extract_strided_slice %31 {offsets = [0, 8], sizes = [8, 8], strides = [1, 1]} : vector<8x16xf32> to vector<8x8xf32>
    %cst_25 = arith.constant 5.000000e-01 : f32
    %34 = vector.broadcast %cst_25 : f32 to vector<8x8xf32>
    %35 = arith.mulf %34, %33 : vector<8x8xf32>
    %36 = math.exp %35 : vector<8x8xf32>
    %37 = arith.mulf %1, %36 : vector<8x8xf32>
    %38 = arith.addf %32, %37 : vector<8x8xf32>
    %c0_26 = arith.constant 0 : index
    %c0_27 = arith.constant 0 : index
    %39 = vector.load %arg3[%c0_26, %c0_27] : memref<8x320xf32, #tpu.memory_space<vmem>>, vector<8x320xf32>
    %cst_28 = arith.constant dense<0.000000e+00> : vector<8x320xf32>
    %40 = tpu.matmul %38, %39, %cst_28 {dimension_numbers = #tpu.dot_dimension_numbers<[1], [0], [0], [1], [0, 0, 1, 1], [], []>} : vector<8x8xf32>, vector<8x320xf32>, vector<8x320xf32> -> vector<8x320xf32>
    %c4 = arith.constant 4 : index
    %c0_29 = arith.constant 0 : index
    %41 = vector.load %arg4[%c4, %c0_29] : memref<11x320xf32, #tpu.memory_space<vmem>>, vector<1x320xf32>
    %42 = vector.broadcast %41 : vector<1x320xf32> to vector<8x320xf32>
    %43 = arith.addf %40, %42 : vector<8x320xf32>
    %cst_30 = arith.constant 0.000000e+00 : f32
    %44 = vector.broadcast %cst_30 : f32 to vector<8x320xf32>
    %45 = arith.maximumf %43, %44 : vector<8x320xf32>
    %46 = vector.extract_strided_slice %45 {offsets = [0, 0], sizes = [8, 160], strides = [1, 1]} : vector<8x320xf32> to vector<8x160xf32>
    %47 = vector.extract_strided_slice %45 {offsets = [0, 160], sizes = [8, 160], strides = [1, 1]} : vector<8x320xf32> to vector<8x160xf32>
    %c3_31 = arith.constant 3 : index
    %c0_32 = arith.constant 0 : index
    %c0_33 = arith.constant 0 : index
    %48 = vector.load %arg1[%c3_31, %c0_32, %c0_33] : memref<6x288x288xf32, #tpu.memory_space<vmem>>, vector<1x160x288xf32>
    %49 = vector.shape_cast %48 : vector<1x160x288xf32> to vector<160x288xf32>
    %cst_34 = arith.constant dense<0.000000e+00> : vector<8x288xf32>
    %50 = tpu.matmul %46, %49, %cst_34 {dimension_numbers = #tpu.dot_dimension_numbers<[1], [0], [0], [1], [0, 0, 1, 1], [], []>} : vector<8x160xf32>, vector<160x288xf32>, vector<8x288xf32> -> vector<8x288xf32>
    %c5 = arith.constant 5 : index
    %c0_35 = arith.constant 0 : index
    %51 = vector.load %arg4[%c5, %c0_35] : memref<11x320xf32, #tpu.memory_space<vmem>>, vector<1x288xf32>
    %52 = vector.broadcast %51 : vector<1x288xf32> to vector<8x288xf32>
    %53 = arith.addf %50, %52 : vector<8x288xf32>
    %cst_36 = arith.constant 0.000000e+00 : f32
    %54 = vector.broadcast %cst_36 : f32 to vector<8x288xf32>
    %55 = arith.maximumf %53, %54 : vector<8x288xf32>
    %c4_37 = arith.constant 4 : index
    %c0_38 = arith.constant 0 : index
    %c0_39 = arith.constant 0 : index
    %56 = vector.load %arg1[%c4_37, %c0_38, %c0_39] : memref<6x288x288xf32, #tpu.memory_space<vmem>>, vector<1x288x280xf32>
    %57 = vector.shape_cast %56 : vector<1x288x280xf32> to vector<288x280xf32>
    %cst_40 = arith.constant dense<0.000000e+00> : vector<8x280xf32>
    %58 = tpu.matmul %55, %57, %cst_40 {dimension_numbers = #tpu.dot_dimension_numbers<[1], [0], [0], [1], [0, 0, 1, 1], [], []>} : vector<8x288xf32>, vector<288x280xf32>, vector<8x280xf32> -> vector<8x280xf32>
    %c6 = arith.constant 6 : index
    %c0_41 = arith.constant 0 : index
    %59 = vector.load %arg4[%c6, %c0_41] : memref<11x320xf32, #tpu.memory_space<vmem>>, vector<1x280xf32>
    %60 = vector.broadcast %59 : vector<1x280xf32> to vector<8x280xf32>
    %61 = arith.addf %58, %60 : vector<8x280xf32>
    %cst_42 = arith.constant 0.000000e+00 : f32
    %62 = vector.broadcast %cst_42 : f32 to vector<8x280xf32>
    %63 = arith.maximumf %61, %62 : vector<8x280xf32>
    %c5_43 = arith.constant 5 : index
    %c0_44 = arith.constant 0 : index
    %c0_45 = arith.constant 0 : index
    %64 = vector.load %arg1[%c5_43, %c0_44, %c0_45] : memref<6x288x288xf32, #tpu.memory_space<vmem>>, vector<1x280x112xf32>
    %65 = vector.shape_cast %64 : vector<1x280x112xf32> to vector<280x112xf32>
    %cst_46 = arith.constant dense<0.000000e+00> : vector<8x112xf32>
    %66 = tpu.matmul %63, %65, %cst_46 {dimension_numbers = #tpu.dot_dimension_numbers<[1], [0], [0], [1], [0, 0, 1, 1], [], []>} : vector<8x280xf32>, vector<280x112xf32>, vector<8x112xf32> -> vector<8x112xf32>
    %c7 = arith.constant 7 : index
    %c0_47 = arith.constant 0 : index
    %67 = vector.load %arg4[%c7, %c0_47] : memref<11x320xf32, #tpu.memory_space<vmem>>, vector<1x112xf32>
    %68 = vector.broadcast %67 : vector<1x112xf32> to vector<8x112xf32>
    %69 = arith.addf %66, %68 : vector<8x112xf32>
    %cst_48 = arith.constant 0.000000e+00 : f32
    %70 = vector.broadcast %cst_48 : f32 to vector<8x112xf32>
    %71 = arith.maximumf %69, %70 : vector<8x112xf32>
    %c1_49 = arith.constant 1 : index
    %c0_50 = arith.constant 0 : index
    %c0_51 = arith.constant 0 : index
    %72 = vector.load %arg2[%c1_49, %c0_50, %c0_51] : memref<4x160x160xf32, #tpu.memory_space<vmem>>, vector<1x160x96xf32>
    %73 = vector.shape_cast %72 : vector<1x160x96xf32> to vector<160x96xf32>
    %cst_52 = arith.constant dense<0.000000e+00> : vector<8x96xf32>
    %74 = tpu.matmul %47, %73, %cst_52 {dimension_numbers = #tpu.dot_dimension_numbers<[1], [0], [0], [1], [0, 0, 1, 1], [], []>} : vector<8x160xf32>, vector<160x96xf32>, vector<8x96xf32> -> vector<8x96xf32>
    %c8 = arith.constant 8 : index
    %c0_53 = arith.constant 0 : index
    %75 = vector.load %arg4[%c8, %c0_53] : memref<11x320xf32, #tpu.memory_space<vmem>>, vector<1x96xf32>
    %76 = vector.broadcast %75 : vector<1x96xf32> to vector<8x96xf32>
    %77 = arith.addf %74, %76 : vector<8x96xf32>
    %cst_54 = arith.constant 0.000000e+00 : f32
    %78 = vector.broadcast %cst_54 : f32 to vector<8x96xf32>
    %79 = arith.maximumf %77, %78 : vector<8x96xf32>
    %c2_55 = arith.constant 2 : index
    %c0_56 = arith.constant 0 : index
    %c0_57 = arith.constant 0 : index
    %80 = vector.load %arg2[%c2_55, %c0_56, %c0_57] : memref<4x160x160xf32, #tpu.memory_space<vmem>>, vector<1x96x56xf32>
    %81 = vector.shape_cast %80 : vector<1x96x56xf32> to vector<96x56xf32>
    %cst_58 = arith.constant dense<0.000000e+00> : vector<8x56xf32>
    %82 = tpu.matmul %79, %81, %cst_58 {dimension_numbers = #tpu.dot_dimension_numbers<[1], [0], [0], [1], [0, 0, 1, 1], [], []>} : vector<8x96xf32>, vector<96x56xf32>, vector<8x56xf32> -> vector<8x56xf32>
    %c9 = arith.constant 9 : index
    %c0_59 = arith.constant 0 : index
    %83 = vector.load %arg4[%c9, %c0_59] : memref<11x320xf32, #tpu.memory_space<vmem>>, vector<1x56xf32>
    %84 = vector.broadcast %83 : vector<1x56xf32> to vector<8x56xf32>
    %85 = arith.addf %82, %84 : vector<8x56xf32>
    %cst_60 = arith.constant 0.000000e+00 : f32
    %86 = vector.broadcast %cst_60 : f32 to vector<8x56xf32>
    %87 = arith.maximumf %85, %86 : vector<8x56xf32>
    %c3_61 = arith.constant 3 : index
    %c0_62 = arith.constant 0 : index
    %c0_63 = arith.constant 0 : index
    %88 = vector.load %arg2[%c3_61, %c0_62, %c0_63] : memref<4x160x160xf32, #tpu.memory_space<vmem>>, vector<1x56x16xf32>
    %89 = vector.shape_cast %88 : vector<1x56x16xf32> to vector<56x16xf32>
    %cst_64 = arith.constant dense<0.000000e+00> : vector<8x16xf32>
    %90 = tpu.matmul %87, %89, %cst_64 {dimension_numbers = #tpu.dot_dimension_numbers<[1], [0], [0], [1], [0, 0, 1, 1], [], []>} : vector<8x56xf32>, vector<56x16xf32>, vector<8x16xf32> -> vector<8x16xf32>
    %c10 = arith.constant 10 : index
    %c0_65 = arith.constant 0 : index
    %91 = vector.load %arg4[%c10, %c0_65] : memref<11x320xf32, #tpu.memory_space<vmem>>, vector<1x16xf32>
    %92 = vector.broadcast %91 : vector<1x16xf32> to vector<8x16xf32>
    %93 = arith.addf %90, %92 : vector<8x16xf32>
    %cst_66 = arith.constant 0.000000e+00 : f32
    %94 = vector.broadcast %cst_66 : f32 to vector<8x16xf32>
    %95 = arith.maximumf %93, %94 : vector<8x16xf32>
    %c0_67 = arith.constant 0 : index
    %c0_68 = arith.constant 0 : index
    %96 = vector.load %arg5[%c0_67, %c0_68] : memref<8x256xf32, #tpu.memory_space<vmem>>, vector<8x112xf32>
    tpu.vector_store %arg5[%c0_67, %c0_68], %71 {strides = array<i32>} : memref<8x256xf32, #tpu.memory_space<vmem>>, vector<8x112xf32>,
    %c0_69 = arith.constant 0 : index
    %c112_70 = arith.constant 112 : index
    %97 = vector.load %arg5[%c0_69, %c112_70] : memref<8x256xf32, #tpu.memory_space<vmem>>, vector<8x16xf32>
    tpu.vector_store %arg5[%c0_69, %c112_70], %95 {strides = array<i32>} : memref<8x256xf32, #tpu.memory_space<vmem>>, vector<8x16xf32>,
    %c0_71 = arith.constant 0 : index
    %c128 = arith.constant 128 : index
    %98 = vector.load %arg5[%c0_71, %c128] : memref<8x256xf32, #tpu.memory_space<vmem>>, vector<8x8xf32>
    tpu.vector_store %arg5[%c0_71, %c128], %32 {strides = array<i32>} : memref<8x256xf32, #tpu.memory_space<vmem>>, vector<8x8xf32>,
    %c0_72 = arith.constant 0 : index
    %c136 = arith.constant 136 : index
    %99 = vector.load %arg5[%c0_72, %c136] : memref<8x256xf32, #tpu.memory_space<vmem>>, vector<8x8xf32>
    tpu.vector_store %arg5[%c0_72, %c136], %33 {strides = array<i32>} : memref<8x256xf32, #tpu.memory_space<vmem>>, vector<8x8xf32>,
    %c0_73 = arith.constant 0 : index
    %c144 = arith.constant 144 : index
    %100 = vector.load %arg5[%c0_73, %c144] : memref<8x256xf32, #tpu.memory_space<vmem>>, vector<8x8xf32>
    tpu.vector_store %arg5[%c0_73, %c144], %38 {strides = array<i32>} : memref<8x256xf32, #tpu.memory_space<vmem>>, vector<8x8xf32>,
    %cst_74 = arith.constant 0.000000e+00 : f32
    %101 = vector.broadcast %cst_74 : f32 to vector<8x104xf32>
    %c0_75 = arith.constant 0 : index
    %c152 = arith.constant 152 : index
    %102 = vector.load %arg5[%c0_75, %c152] : memref<8x256xf32, #tpu.memory_space<vmem>>, vector<8x104xf32>
    tpu.vector_store %arg5[%c0_75, %c152], %101 {strides = array<i32>} : memref<8x256xf32, #tpu.memory_space<vmem>>, vector<8x104xf32>,
    return
  }
}

</mosaic_0001>

<bundles_post_ra>
// kernel: vae_forward.1
= control target key start
LH: loop header
LB: loop body
LE: loop exit
PB: predicated region body
PF: predicated region fallthrough
CT: control target
= control target key end

     0   :  { %10 = vsyncpa [#allocation3], 0  ;;  %s2986_s0 = inlined_call_operand.vmem [shape: f32[8,128], index: 0, kind: input, shape index: {}]   ;;  %s2987_s1 = inlined_call_operand.hbm [shape: f32[6,288,288], index: 1, kind: input, shape index: {}]   ;;  %s2988_s2 = inlined_call_operand.hbm [shape: f32[4,160,160], index: 2, kind: input, shape index: {}]   ;;  %s2989_s3 = inlined_call_operand.hbm [shape: f32[8,320], index: 3, kind: input, shape index: {}]   ;;  %s2990_s4 = inlined_call_operand.hbm [shape: f32[11,320], index: 4, kind: input, shape index: {}]   ;;  %s2991_s5 = inlined_call_operand.vmem [shape: f32[8,256], index: 5, kind: output, shape index: {}]  }
   0x1   :  { %11 = vsyncpa [#allocation5], 0 }
   0x2   :  { %12 = vsyncpa [#allocation8], 0  ;;  %s2708_s18 = smov [#allocation4]  }
   0x3   :  { %s32_s19 = sshll.u32 %s2708_s18, 4  ;;  %s33_s19 = int_to_ptr.vmem [resolvable:$true] %s32_s19 }
   0x4   :  { %s2630_s20 = scalar_lea.vmem %s33_s19, 20480  ;;  %p2635_p1 = scmp.lt.s32.totalorder %s33_s19, %s33_s19 }
   0x5   :  { %p2631_p0 = scmp.ne.s32.totalorder %s33_s19, %s2630_s20  ;;  %p2636_p2 = scmp.lt.s32.totalorder %s2630_s20, %s2630_s20 }
   0x7   :  { %p2637_p3 = por %p2636_p2, %p2635_p1 }
   0x9   :  { %p2638_p4 = pnand %p2637_p3, %p2631_p0 }
   0xb   :  { %2641 = shalt.err (!%p2638_p4)
}
   0xc   :  { %s2709_s21 = smov 256   ;;  %s2710_s22 = smov 16  }
   0xd   :  { %38 = dma.hbm_to_vmem [thread:$0]  %s2988_s2, 20480, %s33_s19, [#allocation5], %s2709_s21, %s2709_s21, %s2710_s22  }
   0xe   :  { %s2711_s25 = smov [#allocation2]  }
   0xf   :  { %s20_s26 = sshll.u32 %s2711_s25, 4  ;;  %s21_s26 = int_to_ptr.vmem [resolvable:$true] %s20_s26 }
  0x10   :  { %s2650_s27 = scalar_lea.vmem %s21_s26, 82944  ;;  %p2655_p6 = scmp.lt.s32.totalorder %s21_s26, %s21_s26 }
  0x11   :  { %p2651_p5 = scmp.ne.s32.totalorder %s21_s26, %s2650_s27  ;;  %p2656_p7 = scmp.lt.s32.totalorder %s2650_s27, %s2650_s27 }
  0x13   :  { %p2657_p8 = por %p2656_p7, %p2655_p6 }
  0x15   :  { %p2658_p9 = pnand %p2657_p8, %p2651_p5 }
  0x17   :  { %2661 = shalt.err (!%p2658_p9)
}
  0x18   :  { %s2712_s28 = smov 384   ;;  %s2713_s29 = smov 24  }
  0x19   :  { %26 = dma.hbm_to_vmem [thread:$0]  %s2987_s1, 82944, %s21_s26, [#allocation3], %s2712_s28, %s2712_s28, %s2713_s29  }
  0x1a   :  { %s2714_s7 = smov [#allocation6]   ;;  %s2715_s9 = smov [#allocation7]  }
  0x1b   :  { %s45_s8 = sshll.u32 %s2714_s7, 4  ;;  %s54_s2 = sshll.u32 %s2715_s9, 4  ;;  %s46_s8 = int_to_ptr.vmem [resolvable:$true] %s45_s8  ;;  %s55_s2 = int_to_ptr.vmem [resolvable:$true] %s54_s2 }
  0x1c   :  { %s2670_s10 = scalar_lea.vmem %s46_s8, 384  ;;  %p2675_p11 = scmp.lt.s32.totalorder %s46_s8, %s46_s8 }
  0x1d   :  { %p2671_p10 = scmp.ne.s32.totalorder %s46_s8, %s2670_s10  ;;  %p2676_p12 = scmp.lt.s32.totalorder %s2670_s10, %s2670_s10 }
  0x1f   :  { %p2677_p13 = por %p2676_p12, %p2675_p11 }
  0x21   :  { %p2678_p0 = pnand %p2677_p13, %p2671_p10 }
  0x23   :  { %2681 = shalt.err (!%p2678_p0)
}
  0x24   :  { %48 = dma.hbm_to_vmem [thread:$0]  %s2989_s3, 384, %s46_s8, [#allocation5]  }
  0x25   :  { %s2690_s13 = scalar_lea.vmem %s55_s2, 768  ;;  %p2695_p2 = scmp.lt.s32.totalorder %s55_s2, %s55_s2 }
  0x26   :  { %p2691_p1 = scmp.ne.s32.totalorder %s55_s2, %s2690_s13  ;;  %p2696_p3 = scmp.lt.s32.totalorder %s2690_s13, %s2690_s13 }
  0x28   :  { %p2697_p4 = por %p2696_p3, %p2695_p2 }
  0x2a   :  { %p2698_p5 = pnand %p2697_p4, %p2691_p1 }
  0x2c   :  { %2701 = shalt.err (!%p2698_p5)
}
  0x2d   :  { %60 = dma.hbm_to_vmem [thread:$0]  %s2990_s4, 768, %s55_s2, [#allocation8], %s2712_s28, %s2712_s28, %s2713_s29  }
  0x2e   :  { %2702 = dma.done.wait [#allocation3], 82944  }
  0x2f   :  { %2703 = vsyncadd [#allocation3], 4294884352 }
  0x30   :  { %2704 = dma.done.wait [#allocation5], 20864  }
  0x31   :  { %2705 = vsyncadd [#allocation5], 4294946432 }
  0x32   :  { %2706 = dma.done.wait [#allocation8], 768  }
  0x33   :  { %2707 = vsyncadd [#allocation8], 4294966528  ;;  %v2716_v0 = vmov 0.0   ;;  %vm2717_vm0 = vmmov 0   ;;  %v114_v1 = vld [vmem:[#allocation2 + $0x140] sm:$0xff]  ;;  %v115_v2 = vld [vmem:[#allocation2 + $0x148] sm:$0xff] }
  0x34   :  { %2497 = vmatprep.subr.mxu1 %v2716_v0  ;;  %2525 = vmatprep.mubr.msk.f32.mxu1 %vm2717_vm0, %v2716_v0  ;;  %v113_v3 = vld [vmem:[#allocation2 + $0x138] sm:$0xff]  ;;  %v111_v4 = vld [vmem:[#allocation2 + $0x128] sm:$0xff]  ;;  %v112_v5 = vld [vmem:[#allocation2 + $0x130] sm:$0xff]  ;;  %vm133_vm1 = vcmask 916480   ;;  %vm405_vm2 = vcmask 195584   ;;  %vm780_vm3 = vcmask 261120  }
  0x35   :  { %201 = vmatprep.mubr.f32.mxu0 %v2716_v0  ;;  %141 = vmatprep.subr.mxu0 %v114_v1  ;;  %v110_v6 = vld [vmem:[#allocation2 + $0x120] sm:$0xff]  ;;  %v108_v7 = vld [vmem:[#allocation2 + $0x110] sm:$0xff]  ;;  %v109_v8 = vld [vmem:[#allocation2 + $0x118] sm:$0xff]  ;;  %vm1056_vm4 = vcmask 64512   ;;  %vm2309_vm5 = vcmask 130112   ;;  %s2718_s19 = smov 104  }
  0x36   :  { %2498 = vmatpush3.msra.mxu1 %v115_v2  ;;  %142 = vmatpush1.msra.mxu0 %v113_v3  ;;  %v107_v9 = vld [vmem:[#allocation2 + $0x108] sm:$0xff]  ;;  %v105_v10 = vld [vmem:[#allocation2 + $0xf8] sm:$0xff]  ;;  %v106_v11 = vld [vmem:[#allocation2 + $0x100] sm:$0xff]  ;;  %vm2314_vm6 = vcmask 195712   ;;  %vm2316_vm7 = vcmask 1047744   ;;  %s2719_s25 = smov 96  }
  0x37   :  { %2499 = vmatprep.subr.mxu1 %v2716_v0  ;;  %143 = vmatprep.subr.mxu0 %v111_v4  ;;  %v104_v12 = vld [vmem:[#allocation2 + $0xf0] sm:$0xff]  ;;  %v102_v13 = vld [vmem:[#allocation2 + $0xe0] sm:$0xff]  ;;  %v103_v14 = vld [vmem:[#allocation2 + $0xe8] sm:$0xff]  ;;  %vm2053_vm8 = vcmask 785408   ;;  %vm2226_vm9 = vcmask 457728   ;;  %s2720_s28 = smov 112  }
  0x38   :  { %2500 = vmatpush3.msra.mxu1 %v112_v5  ;;  %144 = vmatpush1.msra.mxu0 %v110_v6  ;;  %v101_v15 = vld [vmem:[#allocation2 + $0xd8] sm:$0xff]  ;;  %v99_v16 = vld [vmem:[#allocation2 + $0xc8] sm:$0xff]  ;;  %v100_v17 = vld [vmem:[#allocation2 + $0xd0] sm:$0xff]  ;;  %vm2306_vm10 = vcmask 1048448  }
  0x39   :  { %2501 = vmatprep.subr.mxu1 %v2716_v0  ;;  %145 = vmatprep.subr.mxu0 %v108_v7  ;;  %v98_v18 = vld [vmem:[#allocation2 + $0xc0] sm:$0xff]  ;;  %v96_v19 = vld [vmem:[#allocation2 + $0xb0] sm:$0xff]  ;;  %v97_v20 = vld [vmem:[#allocation2 + $0xb8] sm:$0xff] }
  0x3a   :  { %2502 = vmatpush3.msra.mxu1 %v109_v8  ;;  %146 = vmatpush1.msra.mxu0 %v107_v9  ;;  %v95_v21 = vld [vmem:[#allocation2 + $0xa8] sm:$0xff]  ;;  %v93_v22 = vld [vmem:[#allocation2 + $0x98] sm:$0xff]  ;;  %v94_v23 = vld [vmem:[#allocation2 + $0xa0] sm:$0xff] }
  0x3b   :  { %2503 = vmatprep.subr.mxu1 %v2716_v0  ;;  %147 = vmatprep.subr.mxu0 %v105_v10  ;;  %v92_v24 = vld [vmem:[#allocation2 + $0x90] sm:$0xff]  ;;  %v90_v25 = vld [vmem:[#allocation2 + $0x80] sm:$0xff]  ;;  %v91_v26 = vld [vmem:[#allocation2 + $0x88] sm:$0xff] }
  0x3c   :  { %2504 = vmatpush3.msra.mxu1 %v106_v11  ;;  %148 = vmatpush1.msra.mxu0 %v104_v12  ;;  %v89_v27 = vld [vmem:[#allocation2 + $0x78] sm:$0xff]  ;;  %v87_v28 = vld [vmem:[#allocation2 + $0x68] sm:$0xff]  ;;  %v88_v29 = vld [vmem:[#allocation2 + $0x70] sm:$0xff] }
  0x3d   :  { %2505 = vmatprep.subr.mxu1 %v2716_v0  ;;  %149 = vmatprep.subr.mxu0 %v102_v13  ;;  %v86_v30 = vld [vmem:[#allocation2 + $0x60] sm:$0xff]  ;;  %v84_v31 = vld [vmem:[#allocation2 + $0x50] sm:$0xff]  ;;  %v85_v32 = vld [vmem:[#allocation2 + $0x58] sm:$0xff] }
  0x3e   :  { %2506 = vmatpush3.msra.mxu1 %v103_v14  ;;  %150 = vmatpush1.msra.mxu0 %v101_v15  ;;  %v83_v33 = vld [vmem:[#allocation2 + $0x48] sm:$0xff]  ;;  %v81_v34 = vld [vmem:[#allocation2 + $0x38] sm:$0xff]  ;;  %v82_v35 = vld [vmem:[#allocation2 + $0x40] sm:$0xff] }
  0x3f   :  { %2507 = vmatprep.subr.mxu1 %v2716_v0  ;;  %151 = vmatprep.subr.mxu0 %v99_v16  ;;  %v80_v36 = vld [vmem:[#allocation2 + $0x30] sm:$0xff]  ;;  %v78_v37 = vld [vmem:[#allocation2 + $0x20] sm:$0xff]  ;;  %v79_v38 = vld [vmem:[#allocation2 + $0x28] sm:$0xff] }
  0x40   :  { %2508 = vmatpush3.msra.mxu1 %v100_v17  ;;  %152 = vmatpush1.msra.mxu0 %v98_v18  ;;  %v77_v39 = vld [vmem:[#allocation2 + $0x18] sm:$0xff]  ;;  %v75_v40 = vld [vmem:[#allocation2 + $0x8] sm:$0xff]  ;;  %v76_v41 = vld [vmem:[#allocation2 + $0x10] sm:$0xff] }
  0x41   :  { %2509 = vmatprep.subr.mxu1 %v2716_v0  ;;  %153 = vmatprep.subr.mxu0 %v96_v19  ;;  %v74_v42 = vld [vmem:[#allocation2] sm:$0xff]  ;;  %v328_v44 = vld [vmem:[#allocation2 + $0x4d0] sm:$0xff]  ;;  %v327_v45 = vld [vmem:[#allocation2 + $0x4c8] sm:$0xff] }
  0x42   :  { %2510 = vmatpush3.msra.mxu1 %v97_v20  ;;  %154 = vmatpush1.msra.mxu0 %v95_v21  ;;  %v73_v43 = vld [vmem:[%s2986_s0] sm:$0xff]  ;;  %v325_v46 = vld [vmem:[#allocation2 + $0x4b8] sm:$0xff]  ;;  %v324_v47 = vld [vmem:[#allocation2 + $0x4b0] sm:$0xff] }
  0x43   :  { %2511 = vmatprep.subr.mxu1 %v2716_v0  ;;  %155 = vmatprep.subr.mxu0 %v93_v22  ;;  %v322_v48 = vld [vmem:[#allocation2 + $0x4a0] sm:$0xff]  ;;  %v321_v49 = vld [vmem:[#allocation2 + $0x498] sm:$0xff]  ;;  %v319_v50 = vld [vmem:[#allocation2 + $0x488] sm:$0xff] }
  0x44   :  { %2512 = vmatpush3.msra.mxu1 %v94_v23  ;;  %156 = vmatpush1.msra.mxu0 %v92_v24  ;;  %v385_v51 = vld [vmem:[#allocation2 + $0x698] sm:$0xff]  ;;  %v318_v52 = vld [vmem:[#allocation2 + $0x480] sm:$0xff]  ;;  %v384_v53 = vld [vmem:[#allocation2 + $0x690] sm:$0xff] }
  0x45   :  { %2513 = vmatprep.subr.mxu1 %v2716_v0  ;;  %157 = vmatprep.subr.mxu0 %v90_v25  ;;  %v316_v54 = vld [vmem:[#allocation2 + $0x470] sm:$0xff]  ;;  %v315_v55 = vld [vmem:[#allocation2 + $0x468] sm:$0xff]  ;;  %v313_v56 = vld [vmem:[#allocation2 + $0x458] sm:$0xff] }
  0x46   :  { %2514 = vmatpush3.msra.mxu1 %v91_v26  ;;  %158 = vmatpush1.msra.mxu0 %v89_v27  ;;  %v312_v57 = vld [vmem:[#allocation2 + $0x450] sm:$0xff]  ;;  %v310_v58 = vld [vmem:[#allocation2 + $0x440] sm:$0xff]  ;;  %v309_v59 = vld [vmem:[#allocation2 + $0x438] sm:$0xff] }
  0x47   :  { %2515 = vmatprep.subr.mxu1 %v2716_v0  ;;  %159 = vmatprep.subr.mxu0 %v87_v28  ;;  %v307_v60 = vld [vmem:[#allocation2 + $0x428] sm:$0xff]  ;;  %v306_v61 = vld [vmem:[#allocation2 + $0x420] sm:$0xff]  ;;  %v304_v62 = vld [vmem:[#allocation2 + $0x410] sm:$0xff] }
  0x48   :  { %2516 = vmatpush3.msra.mxu1 %v88_v29  ;;  %160 = vmatpush1.msra.mxu0 %v86_v30  ;;  %v303_v63 = vld [vmem:[#allocation2 + $0x408] sm:$0xff]  ;;  %v301_v1 = vld [vmem:[#allocation2 + $0x3f8] sm:$0xff]  ;;  %v300_v2 = vld [vmem:[#allocation2 + $0x3f0] sm:$0xff] }
  0x49   :  { %2517 = vmatprep.subr.mxu1 %v2716_v0  ;;  %161 = vmatprep.subr.mxu0 %v84_v31  ;;  %v298_v3 = vld [vmem:[#allocation2 + $0x3e0] sm:$0xff]  ;;  %v297_v4 = vld [vmem:[#allocation2 + $0x3d8] sm:$0xff]  ;;  %v295_v5 = vld [vmem:[#allocation2 + $0x3c8] sm:$0xff] }
  0x4a   :  { %2518 = vmatpush3.msra.mxu1 %v85_v32  ;;  %162 = vmatpush1.msra.mxu0 %v83_v33  ;;  %v294_v6 = vld [vmem:[#allocation2 + $0x3c0] sm:$0xff]  ;;  %v292_v7 = vld [vmem:[#allocation2 + $0x3b0] sm:$0xff]  ;;  %v291_v8 = vld [vmem:[#allocation2 + $0x3a8] sm:$0xff] }
  0x4b   :  { %2519 = vmatprep.subr.mxu1 %v2716_v0  ;;  %163 = vmatprep.subr.mxu0 %v81_v34  ;;  %v289_v9 = vld [vmem:[#allocation2 + $0x398] sm:$0xff]  ;;  %v288_v10 = vld [vmem:[#allocation2 + $0x390] sm:$0xff]  ;;  %v286_v11 = vld [vmem:[#allocation2 + $0x380] sm:$0xff] }
  0x4c   :  { %2520 = vmatpush3.msra.mxu1 %v82_v35  ;;  %164 = vmatpush1.msra.mxu0 %v80_v36  ;;  %v285_v12 = vld [vmem:[#allocation2 + $0x378] sm:$0xff]  ;;  %v283_v13 = vld [vmem:[#allocation2 + $0x368] sm:$0xff]  ;;  %v282_v14 = vld [vmem:[#allocation2 + $0x360] sm:$0xff] }
  0x4d   :  { %2521 = vmatprep.subr.mxu1 %v2716_v0  ;;  %165 = vmatprep.subr.mxu0 %v78_v37  ;;  %v376_v15 = vld [vmem:[#allocation2 + $0x650] sm:$0xff]  ;;  %v375_v16 = vld [vmem:[#allocation2 + $0x648] sm:$0xff]  ;;  %v373_v17 = vld [vmem:[#allocation2 + $0x638] sm:$0xff] }
  0x4e   :  { %2522 = vmatpush3.msra.mxu1 %v79_v38  ;;  %166 = vmatpush1.msra.mxu0 %v77_v39  ;;  %v372_v18 = vld [vmem:[#allocation2 + $0x630] sm:$0xff]  ;;  %v370_v19 = vld [vmem:[#allocation2 + $0x620] sm:$0xff]  ;;  %v369_v20 = vld [vmem:[#allocation2 + $0x618] sm:$0xff] }
  0x4f   :  { %2523 = vmatprep.subr.mxu1 %v2716_v0  ;;  %167 = vmatprep.subr.mxu0 %v75_v40  ;;  %v367_v21 = vld [vmem:[#allocation2 + $0x608] sm:$0xff]  ;;  %v366_v22 = vld [vmem:[#allocation2 + $0x600] sm:$0xff]  ;;  %v364_v23 = vld [vmem:[#allocation2 + $0x5f0] sm:$0xff] }
  0x50   :  { %2524 = vmatpush3.msra.mxu1 %v76_v41  ;;  %168 = vmatpush1.msra.mxu0 %v74_v42  ;;  %v363_v24 = vld [vmem:[#allocation2 + $0x5e8] sm:$0xff]  ;;  %v361_v25 = vld [vmem:[#allocation2 + $0x5d8] sm:$0xff]  ;;  %v360_v26 = vld [vmem:[#allocation2 + $0x5d0] sm:$0xff] }
  0x51   :  { %2526 = vmatmul.mubr.msk.f32.vlgmr.msra.gmra.mxu1 %vm133_vm1, %v73_v43  ;;  %2325 = vmatmul.mubr.msk.f32.vlgmr.msra.gmra.mxu0 %vm133_vm1, %v73_v43  ;;  %v358_v27 = vld [vmem:[#allocation2 + $0x5c0] sm:$0xff]  ;;  %v357_v28 = vld [vmem:[#allocation2 + $0x5b8] sm:$0xff]  ;;  %v355_v29 = vld [vmem:[#allocation2 + $0x5a8] sm:$0xff] }
  0x52   :  { %409 = vmatprep.subr.mxu0 %v328_v44  ;;  %544 = vmatprep.mubr.f32.mxu1 %v2716_v0  ;;  %v354_v30 = vld [vmem:[#allocation2 + $0x5a0] sm:$0xff]  ;;  %v352_v31 = vld [vmem:[#allocation2 + $0x590] sm:$0xff]  ;;  %v351_v32 = vld [vmem:[#allocation2 + $0x588] sm:$0xff] }
  0x53   :  { %410 = vmatpush1.msra.mxu0 %v327_v45  ;;  %506 = vmatprep.subr.mxu1 %v385_v51  ;;  %v349_v33 = vld [vmem:[#allocation2 + $0x578] sm:$0xff]  ;;  %v348_v34 = vld [vmem:[#allocation2 + $0x570] sm:$0xff]  ;;  %v346_v35 = vld [vmem:[#allocation2 + $0x560] sm:$0xff] }
  0x54   :  { %411 = vmatprep.subr.mxu0 %v325_v46  ;;  %507 = vmatpush1.msra.mxu1 %v384_v53  ;;  %v345_v36 = vld [vmem:[#allocation2 + $0x558] sm:$0xff]  ;;  %v343_v37 = vld [vmem:[#allocation2 + $0x548] sm:$0xff]  ;;  %v342_v38 = vld [vmem:[#allocation2 + $0x540] sm:$0xff] }
  0x55   :  { %412 = vmatpush1.msra.mxu0 %v324_v47  ;;  %v382_v39 = vld [vmem:[#allocation2 + $0x680] sm:$0xff]  ;;  %v340_v40 = vld [vmem:[#allocation2 + $0x530] sm:$0xff]  ;;  %v381_v41 = vld [vmem:[#allocation2 + $0x678] sm:$0xff] }
  0x56   :  { %413 = vmatprep.subr.mxu0 %v322_v48  ;;  %508 = vmatprep.subr.mxu1 %v382_v39  ;;  %v339_v42 = vld [vmem:[#allocation2 + $0x528] sm:$0xff]  ;;  %v337_v44 = vld [vmem:[#allocation2 + $0x518] sm:$0xff]  ;;  %v378_v45 = vld [vmem:[#allocation2 + $0x660] sm:$0xff] }
  0x57   :  { %414 = vmatpush1.msra.mxu0 %v321_v49  ;;  %509 = vmatpush1.msra.mxu1 %v381_v41  ;;  %v379_v43 = vld [vmem:[#allocation2 + $0x668] sm:$0xff]  ;;  %v336_v46 = vld [vmem:[#allocation2 + $0x510] sm:$0xff]  ;;  %v377_v47 = vld [vmem:[#allocation2 + $0x658] sm:$0xff] }
  0x58   :  { %415 = vmatprep.subr.mxu0 %v319_v50  ;;  %510 = vmatprep.subr.mxu1 %v379_v43  ;;  %v334_v48 = vld [vmem:[#allocation2 + $0x500] sm:$0xff]  ;;  %v333_v49 = vld [vmem:[#allocation2 + $0x4f8] sm:$0xff]  ;;  %v331_v50 = vld [vmem:[#allocation2 + $0x4e8] sm:$0xff] }
  0x59   :  { %416 = vmatpush1.msra.mxu0 %v318_v52  ;;  %511 = vmatpush1.msra.mxu1 %v378_v45  ;;  %v330_v51 = vld [vmem:[#allocation2 + $0x4e0] sm:$0xff]  ;;  %v118_v52 = vlaneseq  ;;  %v380_v41 = vld [vmem:[#allocation2 + $0x670] sm:$0xff]  ;;  %v725_v43 = vld [vmem:[#allocation2 + $0x828] sm:$0xff] }
  0x5a   :  { %417 = vmatprep.subr.mxu0 %v316_v54  ;;  %2356 = vmatprep.subr.mxu1 %v377_v47  ;;  %v386_v39 = vld [vmem:[#allocation2 + $0x6a0] sm:$0xff]  ;;  %v723_v45 = vld [vmem:[#allocation2 + $0x810] sm:$0xff]  ;;  %v721_v47 = vld [vmem:[#allocation2 + $0x7f8] sm:$0xff] }
  0x5b   :  { %418 = vmatpush1.msra.mxu0 %v315_v55  ;;  %v119_v53 = vshrl.u32 %v118_v52, 7  ;;  %v116_v55 = vld [vmem:[#allocation7] ss:$8 sm:$0x7] }
  0x5c   :  { %419 = vmatprep.subr.mxu0 %v313_v56  ;;  %v716_v52 = vld [vmem:[#allocation2 + $0x7b8] sm:$0xff] }
  0x5d   :  { %420 = vmatpush1.msra.mxu0 %v312_v57  ;;  %v2788_v54 = vsub.s32 2, %v119_v53  ;;  %v2790_v56 = vsub.s32 0, %v119_v53  ;;  %v2792_v57 = vsub.s32 1, %v119_v53  ;;  %v715_v53 = vld [vmem:[#allocation2 + $0x7b0] sm:$0xff] }
  0x5e   :  { %421 = vmatprep.subr.mxu0 %v310_v58 }
  0x5f   :  { %422 = vmatpush1.msra.mxu0 %v309_v59  ;;  %v129_v58 = vrot.slane %v116_v55, %v2788_v54  ;;  %v121_v59 = vrot.slane %v116_v55, %v2790_v56 }
  0x60   :  { %423 = vmatprep.subr.mxu0 %v307_v60 }
  0x61   :  { %424 = vmatpush1.msra.mxu0 %v306_v61  ;;  %v125_v61 = vrot.slane %v116_v55, %v2792_v57  ;;  %v714_v55 = vld [vmem:[#allocation2 + $0x7a0] sm:$0xff] }
  0x62   :  { %425 = vmatprep.subr.mxu0 %v304_v62 }
  0x63   :  { %426 = vmatpush1.msra.mxu0 %v303_v63 }
  0x64   :  { %427 = vmatprep.subr.mxu0 %v301_v1 }
  0x65   :  { %428 = vmatpush1.msra.mxu0 %v300_v2 }
  0x66   :  { %429 = vmatprep.subr.mxu0 %v298_v3 }
  0x67   :  { %430 = vmatpush1.msra.mxu0 %v297_v4 }
  0x68   :  { %431 = vmatprep.subr.mxu0 %v295_v5  ;;  %v329_v5 = vld [vmem:[#allocation2 + $0x4d8] sm:$0xff] }
  0x69   :  { %432 = vmatpush1.msra.mxu0 %v294_v6 }
  0x6a   :  { %433 = vmatprep.subr.mxu0 %v292_v7  ;;  %v374_v7 = vld [vmem:[#allocation2 + $0x640] sm:$0xff] }
  0x6b   :  { %434 = vmatpush1.msra.mxu0 %v291_v8 }
  0x6c   :  { %435 = vmatprep.subr.mxu0 %v289_v9  ;;  %v326_v9 = vld [vmem:[#allocation2 + $0x4c0] sm:$0xff] }
  0x6d   :  { %436 = vmatpush1.msra.mxu0 %v288_v10 }
  0x6e   :  { %437 = vmatprep.subr.mxu0 %v286_v11  ;;  %v371_v11 = vld [vmem:[#allocation2 + $0x628] sm:$0xff] }
  0x6f   :  { %438 = vmatpush1.msra.mxu0 %v285_v12  ;;  %v323_v12 = vld [vmem:[#allocation2 + $0x4a8] sm:$0xff] }
  0x70   :  { %439 = vmatprep.subr.mxu0 %v283_v13  ;;  %v368_v13 = vld [vmem:[#allocation2 + $0x610] sm:$0xff] }
  0x71   :  { %440 = vmatpush1.msra.mxu0 %v282_v14  ;;  %v320_v14 = vld [vmem:[#allocation2 + $0x490] sm:$0xff] }
  0x72   :  { %441 = vmatprep.subr.mxu0 %v376_v15  ;;  %v365_v15 = vld [vmem:[#allocation2 + $0x5f8] sm:$0xff] }
  0x73   :  { %442 = vmatpush2.msra.mxu0 %v375_v16  ;;  %v317_v16 = vld [vmem:[#allocation2 + $0x478] sm:$0xff] }
  0x74   :  { %443 = vmatprep.subr.mxu0 %v373_v17  ;;  %v362_v17 = vld [vmem:[#allocation2 + $0x5e0] sm:$0xff] }
  0x75   :  { %444 = vmatpush2.msra.mxu0 %v372_v18  ;;  %v314_v18 = vld [vmem:[#allocation2 + $0x460] sm:$0xff] }
  0x76   :  { %445 = vmatprep.subr.mxu0 %v370_v19  ;;  %v359_v19 = vld [vmem:[#allocation2 + $0x5c8] sm:$0xff] }
  0x77   :  { %446 = vmatpush2.msra.mxu0 %v369_v20  ;;  %v311_v20 = vld [vmem:[#allocation2 + $0x448] sm:$0xff] }
  0x78   :  { %447 = vmatprep.subr.mxu0 %v367_v21  ;;  %v356_v21 = vld [vmem:[#allocation2 + $0x5b0] sm:$0xff] }
  0x79   :  { %448 = vmatpush2.msra.mxu0 %v366_v22  ;;  %v308_v22 = vld [vmem:[#allocation2 + $0x430] sm:$0xff] }
  0x7a   :  { %449 = vmatprep.subr.mxu0 %v364_v23  ;;  %v353_v23 = vld [vmem:[#allocation2 + $0x598] sm:$0xff] }
  0x7b   :  { %450 = vmatpush2.msra.mxu0 %v363_v24  ;;  %v305_v24 = vld [vmem:[#allocation2 + $0x418] sm:$0xff] }
  0x7c   :  { %451 = vmatprep.subr.mxu0 %v361_v25  ;;  %v350_v25 = vld [vmem:[#allocation2 + $0x580] sm:$0xff] }
  0x7d   :  { %452 = vmatpush2.msra.mxu0 %v360_v26  ;;  %v302_v26 = vld [vmem:[#allocation2 + $0x400] sm:$0xff] }
  0x7e   :  { %453 = vmatprep.subr.mxu0 %v358_v27  ;;  %v347_v27 = vld [vmem:[#allocation2 + $0x568] sm:$0xff] }
  0x7f   :  { %454 = vmatpush2.msra.mxu0 %v357_v28  ;;  %v299_v28 = vld [vmem:[#allocation2 + $0x3e8] sm:$0xff] }
  0x80   :  { %455 = vmatprep.subr.mxu0 %v355_v29  ;;  %v344_v29 = vld [vmem:[#allocation2 + $0x550] sm:$0xff] }
  0x81   :  { %456 = vmatpush2.msra.mxu0 %v354_v30  ;;  %v296_v30 = vld [vmem:[#allocation2 + $0x3d0] sm:$0xff] }
  0x82   :  { %457 = vmatprep.subr.mxu0 %v352_v31  ;;  %v341_v31 = vld [vmem:[#allocation2 + $0x538] sm:$0xff] }
  0x83   :  { %458 = vmatpush2.msra.mxu0 %v351_v32  ;;  %v293_v32 = vld [vmem:[#allocation2 + $0x3b8] sm:$0xff] }
  0x84   :  { %459 = vmatprep.subr.mxu0 %v349_v33  ;;  %v338_v33 = vld [vmem:[#allocation2 + $0x520] sm:$0xff] }
  0x85   :  { %460 = vmatpush2.msra.mxu0 %v348_v34  ;;  %v290_v34 = vld [vmem:[#allocation2 + $0x3a0] sm:$0xff] }
  0x86   :  { %461 = vmatprep.subr.mxu0 %v346_v35  ;;  %v335_v35 = vld [vmem:[#allocation2 + $0x508] sm:$0xff] }
  0x87   :  { %462 = vmatpush2.msra.mxu0 %v345_v36  ;;  %v287_v36 = vld [vmem:[#allocation2 + $0x388] sm:$0xff] }
  0x88   :  { %463 = vmatprep.subr.mxu0 %v343_v37  ;;  %v332_v37 = vld [vmem:[#allocation2 + $0x4f0] sm:$0xff] }
  0x89   :  { %464 = vmatpush2.msra.mxu0 %v342_v38  ;;  %v284_v38 = vld [vmem:[#allocation2 + $0x370] sm:$0xff] }
  0x8a   :  { %465 = vmatprep.subr.mxu0 %v340_v40  ;;  %v383_v40 = vld [vmem:[#allocation2 + $0x688] sm:$0xff] }
  0x8b   :  { %466 = vmatpush2.msra.mxu0 %v339_v42  ;;  %v726_v42 = vld [vmem:[#allocation2 + $0x830] sm:$0xff] }
  0x8c   :  { %467 = vmatprep.subr.mxu0 %v337_v44  ;;  %v724_v44 = vld [vmem:[#allocation2 + $0x818] sm:$0xff] }
  0x8d   :  { %468 = vmatpush2.msra.mxu0 %v336_v46  ;;  %v722_v46 = vld [vmem:[#allocation2 + $0x800] sm:$0xff] }
  0x8e   :  { %469 = vmatprep.subr.mxu0 %v334_v48  ;;  %v720_v48 = vld [vmem:[#allocation2 + $0x7e8] sm:$0xff] }
  0x8f   :  { %470 = vmatpush2.msra.mxu0 %v333_v49  ;;  %v719_v49 = vld [vmem:[#allocation2 + $0x7e0] sm:$0xff] }
  0x90   :  { %471 = vmatprep.subr.mxu0 %v331_v50  ;;  %v718_v50 = vld [vmem:[#allocation2 + $0x7d0] sm:$0xff] }
  0x91   :  { %472 = vmatpush2.msra.mxu0 %v330_v51  ;;  %v717_v51 = vld [vmem:[#allocation2 + $0x7c8] sm:$0xff] }
  0x92   :  { %952 = vmatprep.subr.mxu0 %v2716_v0 }
 0x111   :  { %v274_v60 = vpop.f32.mrf.mxu1  ;;  %v203_v63 = vpop.f32.mrf.mxu0 }
 0x112   :  { %v2797_v62 = vadd.f32 %v274_v60, %v129_v58  ;;  %v2799_v1 = vadd.f32 %v203_v63, %v121_v59  ;;  %v713_v58 = vld [vmem:[#allocation2 + $0x798] sm:$0xff]  ;;  %v712_v59 = vld [vmem:[#allocation2 + $0x788] sm:$0xff]  ;;  %v711_v60 = vld [vmem:[#allocation2 + $0x780] sm:$0xff] }
 0x113   :  { %v2527_v2 = vpop.f32.mrf.mxu1  ;;  %v205_v4 = vpop.f32.mrf.mxu0  ;;  %v708_v63 = vld [vmem:[#allocation2 + $0x758] sm:$0xff] }
 0x114   :  { %v280_v3 = vmax.f32 %v2797_v62, 0.0  ;;  %v206_v6 = vadd.f32 %v205_v4, %v125_v61  ;;  %v278_v8 = vmax.f32 %v2799_v1, 0.0  ;;  %v710_v61 = vld [vmem:[#allocation2 + $0x770] sm:$0xff]  ;;  %v709_v62 = vld [vmem:[#allocation2 + $0x768] sm:$0xff]  ;;  %v706_v2 = vld [vmem:[#allocation2 + $0x740] sm:$0xff] }
 0x115   :  { %v707_v1 = vld [vmem:[#allocation2 + $0x750] sm:$0xff]  ;;  %v704_v4 = vld [vmem:[#allocation2 + $0x728] sm:$0xff] }
 0x116   :  { %2327 = vmatmul.mubr.msk.f32.vlgmr.msra.gmra.mxu1 %vm405_vm2, %v280_v3  ;;  %v279_v10 = vmax.f32 %v206_v6, 0.0  ;;  %v702_v6 = vld [vmem:[#allocation2 + $0x710] sm:$0xff] }
 0x117   :  { %2357 = vmatpush3.msra.mxu1 %v329_v5  ;;  %v703_v5 = vld [vmem:[#allocation2 + $0x720] sm:$0xff] }
 0x118   :  { %2358 = vmatprep.subr.mxu1 %v374_v7  ;;  %473 = vmatprep.mubr.f32.mxu0 %v279_v10  ;;  %v701_v7 = vld [vmem:[#allocation2 + $0x708] sm:$0xff] }
 0x119   :  { %2359 = vmatpush3.msra.mxu1 %v326_v9  ;;  %474 = vmatmul.mubr.f32.vlgmr.msra.gmra.mxu0 %v278_v8  ;;  %v699_v9 = vld [vmem:[#allocation2 + $0x6f0] sm:$0xff] }
 0x11a   :  { %2360 = vmatprep.subr.mxu1 %v371_v11  ;;  %615 = vmatprep.mubr.f32.mxu1 %v279_v10  ;;  %v698_v10 = vld [vmem:[#allocation2 + $0x6e0] sm:$0xff]  ;;  %v697_v11 = vld [vmem:[#allocation2 + $0x6d8] sm:$0xff] }
 0x11b   :  { %2361 = vmatpush3.msra.mxu1 %v323_v12  ;;  %v696_v12 = vld [vmem:[#allocation2 + $0x6c8] sm:$0xff] }
 0x11c   :  { %2362 = vmatprep.subr.mxu1 %v368_v13  ;;  %v695_v13 = vld [vmem:[#allocation2 + $0x6c0] sm:$0xff] }
 0x11d   :  { %2363 = vmatpush3.msra.mxu1 %v320_v14  ;;  %v758_v14 = vld [vmem:[#allocation2 + $0x9b0] sm:$0xff] }
 0x11e   :  { %2364 = vmatprep.subr.mxu1 %v365_v15  ;;  %v757_v15 = vld [vmem:[#allocation2 + $0x9a8] sm:$0xff] }
 0x11f   :  { %2365 = vmatpush3.msra.mxu1 %v317_v16  ;;  %v756_v16 = vld [vmem:[#allocation2 + $0x998] sm:$0xff] }
 0x120   :  { %2366 = vmatprep.subr.mxu1 %v362_v17  ;;  %v755_v17 = vld [vmem:[#allocation2 + $0x990] sm:$0xff] }
 0x121   :  { %2367 = vmatpush3.msra.mxu1 %v314_v18  ;;  %v754_v18 = vld [vmem:[#allocation2 + $0x980] sm:$0xff] }
 0x122   :  { %2368 = vmatprep.subr.mxu1 %v359_v19  ;;  %v753_v19 = vld [vmem:[#allocation2 + $0x978] sm:$0xff] }
 0x123   :  { %2369 = vmatpush3.msra.mxu1 %v311_v20  ;;  %v752_v20 = vld [vmem:[#allocation2 + $0x968] sm:$0xff] }
 0x124   :  { %2370 = vmatprep.subr.mxu1 %v356_v21  ;;  %v751_v21 = vld [vmem:[#allocation2 + $0x960] sm:$0xff] }
 0x125   :  { %2371 = vmatpush3.msra.mxu1 %v308_v22  ;;  %v750_v22 = vld [vmem:[#allocation2 + $0x950] sm:$0xff] }
 0x126   :  { %2372 = vmatprep.subr.mxu1 %v353_v23  ;;  %v749_v23 = vld [vmem:[#allocation2 + $0x948] sm:$0xff] }
 0x127   :  { %2373 = vmatpush3.msra.mxu1 %v305_v24  ;;  %v748_v24 = vld [vmem:[#allocation2 + $0x938] sm:$0xff] }
 0x128   :  { %2374 = vmatprep.subr.mxu1 %v350_v25  ;;  %v747_v25 = vld [vmem:[#allocation2 + $0x930] sm:$0xff] }
 0x129   :  { %2375 = vmatpush3.msra.mxu1 %v302_v26  ;;  %v746_v26 = vld [vmem:[#allocation2 + $0x920] sm:$0xff] }
 0x12a   :  { %2376 = vmatprep.subr.mxu1 %v347_v27  ;;  %v745_v27 = vld [vmem:[#allocation2 + $0x918] sm:$0xff] }
 0x12b   :  { %2377 = vmatpush3.msra.mxu1 %v299_v28  ;;  %v744_v28 = vld [vmem:[#allocation2 + $0x908] sm:$0xff] }
 0x12c   :  { %2378 = vmatprep.subr.mxu1 %v344_v29  ;;  %v743_v29 = vld [vmem:[#allocation2 + $0x900] sm:$0xff] }
 0x12d   :  { %2379 = vmatpush3.msra.mxu1 %v296_v30  ;;  %v742_v30 = vld [vmem:[#allocation2 + $0x8f0] sm:$0xff] }
 0x12e   :  { %2380 = vmatprep.subr.mxu1 %v341_v31  ;;  %v741_v31 = vld [vmem:[#allocation2 + $0x8e8] sm:$0xff] }
 0x12f   :  { %2381 = vmatpush3.msra.mxu1 %v293_v32  ;;  %v740_v32 = vld [vmem:[#allocation2 + $0x8d8] sm:$0xff] }
 0x130   :  { %2382 = vmatprep.subr.mxu1 %v338_v33  ;;  %v739_v33 = vld [vmem:[#allocation2 + $0x8d0] sm:$0xff] }
 0x131   :  { %2383 = vmatpush3.msra.mxu1 %v290_v34  ;;  %v738_v34 = vld [vmem:[#allocation2 + $0x8c0] sm:$0xff] }
 0x132   :  { %2384 = vmatprep.subr.mxu1 %v335_v35  ;;  %v737_v35 = vld [vmem:[#allocation2 + $0x8b8] sm:$0xff] }
 0x133   :  { %2385 = vmatpush3.msra.mxu1 %v287_v36  ;;  %v736_v36 = vld [vmem:[#allocation2 + $0x8a8] sm:$0xff] }
 0x134   :  { %2386 = vmatprep.subr.mxu1 %v332_v37  ;;  %v735_v37 = vld [vmem:[#allocation2 + $0x8a0] sm:$0xff] }
 0x135   :  { %2387 = vmatpush3.msra.mxu1 %v284_v38  ;;  %v734_v38 = vld [vmem:[#allocation2 + $0x890] sm:$0xff] }
 0x136   :  { %616 = vmatmul.mubr.f32.vlgmr.msra.gmra.mxu1 %v278_v8  ;;  %2528 = vmatprep.subr.mxu1 %v2716_v0  ;;  %v700_v8 = vld [vmem:[#allocation2 + $0x6f8] sm:$0xff] }
 0x137   :  { %2529 = vmatpush3.msra.mxu1 %v386_v39  ;;  %2534 = vmatprep.mubr.msk.f32.mxu1 %vm2717_vm0, %v2716_v0  ;;  %v733_v39 = vld [vmem:[#allocation2 + $0x888] sm:$0xff] }
 0x138   :  { %2530 = vmatprep.subr.mxu1 %v2716_v0 }
 0x139   :  { %2531 = vmatpush3.msra.mxu1 %v383_v40  ;;  %v732_v40 = vld [vmem:[#allocation2 + $0x878] sm:$0xff] }
 0x13a   :  { %2532 = vmatprep.subr.mxu1 %v2716_v0 }
 0x13b   :  { %2533 = vmatpush3.msra.mxu1 %v380_v41  ;;  %v731_v41 = vld [vmem:[#allocation2 + $0x870] sm:$0xff] }
 0x13c   :  { %2535 = vmatmul.mubr.msk.f32.vlgmr.msra.gmra.mxu1 %vm405_vm2, %v280_v3  ;;  %784 = vmatprep.subr.mxu1 %v726_v42  ;;  %v705_v3 = vld [vmem:[#allocation2 + $0x738] sm:$0xff]  ;;  %v730_v42 = vld [vmem:[#allocation2 + $0x860] sm:$0xff] }
 0x13d   :  { %785 = vmatpush1.msra.mxu1 %v725_v43  ;;  %v729_v43 = vld [vmem:[#allocation2 + $0x858] sm:$0xff] }
 0x13e   :  { %786 = vmatprep.subr.mxu1 %v724_v44  ;;  %v728_v44 = vld [vmem:[#allocation2 + $0x848] sm:$0xff] }
 0x13f   :  { %787 = vmatpush1.msra.mxu1 %v723_v45  ;;  %v727_v45 = vld [vmem:[#allocation2 + $0x840] sm:$0xff] }
 0x140   :  { %788 = vmatprep.subr.mxu1 %v722_v46  ;;  %v766_v46 = vld [vmem:[#allocation2 + $0xa10] sm:$0xff] }
 0x141   :  { %789 = vmatpush1.msra.mxu1 %v721_v47  ;;  %v943_v47 = vld [vmem:[#allocation4 + $0xf0] sm:$0xff] }
 0x142   :  { %790 = vmatprep.subr.mxu1 %v720_v48  ;;  %v942_v48 = vld [vmem:[#allocation4 + $0xe0] sm:$0xff]  ;;  %953 = vmatpush1.msra.mxu0 %v943_v47 }
 0x143   :  { %791 = vmatpush1.msra.mxu1 %v719_v49  ;;  %954 = vmatprep.subr.mxu0 %v2716_v0  ;;  %v388_v49 = vld [vmem:[#allocation7 + $0x1] ss:$8 sm:$0x7] }
 0x144   :  { %792 = vmatprep.subr.mxu1 %v718_v50  ;;  %955 = vmatpush1.msra.mxu0 %v942_v48  ;;  %v393_v50 = vrot.slane %v388_v49, %v2790_v56 }
 0x145   :  { %793 = vmatpush1.msra.mxu1 %v717_v51  ;;  %956 = vmatprep.subr.mxu0 %v2716_v0  ;;  %v397_v51 = vrot.slane %v388_v49, %v2792_v57 }
 0x146   :  { %794 = vmatprep.subr.mxu1 %v716_v52 }
 0x147   :  { %795 = vmatpush1.msra.mxu1 %v715_v53 }
 0x148   :  { %796 = vmatprep.subr.mxu1 %v714_v55 }
 0x149   :  { %797 = vmatpush1.msra.mxu1 %v713_v58 }
 0x14a   :  { %798 = vmatprep.subr.mxu1 %v712_v59 }
 0x14b   :  { %799 = vmatpush1.msra.mxu1 %v711_v60 }
 0x14c   :  { %800 = vmatprep.subr.mxu1 %v710_v61 }
 0x14d   :  { %801 = vmatpush1.msra.mxu1 %v709_v62 }
 0x14e   :  { %802 = vmatprep.subr.mxu1 %v708_v63 }
 0x14f   :  { %803 = vmatpush1.msra.mxu1 %v707_v1 }
 0x150   :  { %804 = vmatprep.subr.mxu1 %v706_v2  ;;  %v765_v2 = vld [vmem:[#allocation2 + $0xa08] sm:$0xff] }
 0x151   :  { %805 = vmatpush1.msra.mxu1 %v705_v3  ;;  %v764_v3 = vld [vmem:[#allocation2 + $0x9f8] sm:$0xff] }
 0x152   :  { %806 = vmatprep.subr.mxu1 %v704_v4  ;;  %v763_v4 = vld [vmem:[#allocation2 + $0x9f0] sm:$0xff] }
 0x153   :  { %807 = vmatpush1.msra.mxu1 %v703_v5  ;;  %v762_v5 = vld [vmem:[#allocation2 + $0x9e0] sm:$0xff] }
 0x154   :  { %808 = vmatprep.subr.mxu1 %v702_v6  ;;  %v761_v6 = vld [vmem:[#allocation2 + $0x9d8] sm:$0xff] }
 0x155   :  { %809 = vmatpush1.msra.mxu1 %v701_v7  ;;  %v760_v7 = vld [vmem:[#allocation2 + $0x9c8] sm:$0xff] }
 0x156   :  { %810 = vmatprep.subr.mxu1 %v700_v8  ;;  %v759_v8 = vld [vmem:[#allocation2 + $0x9c0] sm:$0xff] }
 0x157   :  { %811 = vmatpush1.msra.mxu1 %v699_v9 }
 0x158   :  { %812 = vmatprep.subr.mxu1 %v698_v10  ;;  %v401_v10 = vrot.slane %v388_v49, %v2788_v54  ;;  %v948_v49 = vld [vmem:[#allocation7 + $0x3] ss:$0 sm:$0xff] }
 0x159   :  { %813 = vmatpush1.msra.mxu1 %v697_v11 }
 0x15a   :  { %814 = vmatprep.subr.mxu1 %v696_v12 }
 0x15b   :  { %815 = vmatpush1.msra.mxu1 %v695_v13 }
 0x15c   :  { %816 = vmatprep.subr.mxu1 %v758_v14 }
 0x15d   :  { %817 = vmatpush2.msra.mxu1 %v757_v15 }
 0x15e   :  { %818 = vmatprep.subr.mxu1 %v756_v16 }
 0x15f   :  { %819 = vmatpush2.msra.mxu1 %v755_v17 }
 0x160   :  { %820 = vmatprep.subr.mxu1 %v754_v18  ;;  %v941_v18 = vld [vmem:[#allocation4 + $0xd0] sm:$0xff] }
 0x161   :  { %821 = vmatpush2.msra.mxu1 %v753_v19  ;;  %957 = vmatpush1.msra.mxu0 %v941_v18  ;;  %v940_v19 = vld [vmem:[#allocation4 + $0xc0] sm:$0xff]  ;;  %v1240_v18 = vld [vmem:[#allocation2 + $0xb38] sm:$0xff] }
 0x162   :  { %822 = vmatprep.subr.mxu1 %v752_v20  ;;  %958 = vmatprep.subr.mxu0 %v2716_v0  ;;  %v939_v20 = vld [vmem:[#allocation4 + $0xb0] sm:$0xff] }
 0x163   :  { %823 = vmatpush2.msra.mxu1 %v751_v21  ;;  %959 = vmatpush1.msra.mxu0 %v940_v19  ;;  %v938_v21 = vld [vmem:[#allocation4 + $0xa0] sm:$0xff]  ;;  %v1236_v19 = vld [vmem:[#allocation2 + $0xb18] sm:$0xff] }
 0x164   :  { %824 = vmatprep.subr.mxu1 %v750_v22  ;;  %960 = vmatprep.subr.mxu0 %v2716_v0  ;;  %v937_v22 = vld [vmem:[#allocation4 + $0x90] sm:$0xff] }
 0x165   :  { %825 = vmatpush2.msra.mxu1 %v749_v23  ;;  %961 = vmatpush1.msra.mxu0 %v939_v20  ;;  %v936_v23 = vld [vmem:[#allocation4 + $0x80] sm:$0xff]  ;;  %v1235_v20 = vld [vmem:[#allocation2 + $0xb10] sm:$0xff] }
 0x166   :  { %826 = vmatprep.subr.mxu1 %v748_v24  ;;  %962 = vmatprep.subr.mxu0 %v2716_v0  ;;  %v935_v24 = vld [vmem:[#allocation4 + $0x70] sm:$0xff] }
 0x167   :  { %827 = vmatpush2.msra.mxu1 %v747_v25  ;;  %963 = vmatpush1.msra.mxu0 %v938_v21  ;;  %v934_v25 = vld [vmem:[#allocation4 + $0x60] sm:$0xff] }
 0x168   :  { %828 = vmatprep.subr.mxu1 %v746_v26  ;;  %964 = vmatprep.subr.mxu0 %v2716_v0  ;;  %v933_v26 = vld [vmem:[#allocation4 + $0x50] sm:$0xff]  ;;  %v1237_v21 = vld [vmem:[#allocation2 + $0xb20] sm:$0xff] }
 0x169   :  { %829 = vmatpush2.msra.mxu1 %v745_v27  ;;  %965 = vmatpush1.msra.mxu0 %v937_v22  ;;  %v932_v27 = vld [vmem:[#allocation4 + $0x40] sm:$0xff] }
 0x16a   :  { %830 = vmatprep.subr.mxu1 %v744_v28  ;;  %966 = vmatprep.subr.mxu0 %v2716_v0  ;;  %v931_v28 = vld [vmem:[#allocation4 + $0x30] sm:$0xff]  ;;  %v1233_v22 = vld [vmem:[#allocation2 + $0xb00] sm:$0xff] }
 0x16b   :  { %831 = vmatpush2.msra.mxu1 %v743_v29  ;;  %967 = vmatpush1.msra.mxu0 %v936_v23  ;;  %v930_v29 = vld [vmem:[#allocation4 + $0x20] sm:$0xff]  ;;  %v1232_v23 = vld [vmem:[#allocation2 + $0xaf8] sm:$0xff] }
 0x16c   :  { %832 = vmatprep.subr.mxu1 %v742_v30  ;;  %968 = vmatprep.subr.mxu0 %v2716_v0  ;;  %v929_v30 = vld [vmem:[#allocation4 + $0x10] sm:$0xff] }
 0x16d   :  { %833 = vmatpush2.msra.mxu1 %v741_v31  ;;  %969 = vmatpush1.msra.mxu0 %v935_v24  ;;  %v928_v31 = vld [vmem:[#allocation4] sm:$0xff]  ;;  %v1234_v24 = vld [vmem:[#allocation2 + $0xb08] sm:$0xff] }
 0x16e   :  { %834 = vmatprep.subr.mxu1 %v740_v32  ;;  %970 = vmatprep.subr.mxu0 %v2716_v0  ;;  %v947_v32 = vld [vmem:[#allocation4 + $0x130] sm:$0xff] }
 0x16f   :  { %835 = vmatpush2.msra.mxu1 %v739_v33  ;;  %971 = vmatpush1.msra.mxu0 %v934_v25  ;;  %v946_v33 = vld [vmem:[#allocation4 + $0x120] sm:$0xff]  ;;  %v1230_v25 = vld [vmem:[#allocation2 + $0xae8] sm:$0xff] }
 0x170   :  { %836 = vmatprep.subr.mxu1 %v738_v34  ;;  %972 = vmatprep.subr.mxu0 %v2716_v0  ;;  %v945_v34 = vld [vmem:[#allocation4 + $0x110] sm:$0xff] }
 0x171   :  { %837 = vmatpush2.msra.mxu1 %v737_v35  ;;  %973 = vmatpush1.msra.mxu0 %v933_v26  ;;  %v944_v35 = vld [vmem:[#allocation4 + $0x100] sm:$0xff] }
 0x172   :  { %838 = vmatprep.subr.mxu1 %v736_v36  ;;  %974 = vmatprep.subr.mxu0 %v2716_v0  ;;  %v768_v36 = vld [vmem:[#allocation7 + $0x2] ss:$8 sm:$0x3] }
 0x173   :  { %839 = vmatpush2.msra.mxu1 %v735_v37  ;;  %975 = vmatpush1.msra.mxu0 %v932_v27  ;;  %v1229_v26 = vld [vmem:[#allocation2 + $0xae0] sm:$0xff]  ;;  %v1231_v27 = vld [vmem:[#allocation2 + $0xaf0] sm:$0xff] }
 0x174   :  { %840 = vmatprep.subr.mxu1 %v734_v38  ;;  %976 = vmatprep.subr.mxu0 %v2716_v0  ;;  %v773_v38 = vrot.slane %v768_v36, %v2790_v56 }
 0x175   :  { %841 = vmatpush2.msra.mxu1 %v733_v39  ;;  %977 = vmatpush1.msra.mxu0 %v931_v28  ;;  %v777_v39 = vrot.slane %v768_v36, %v2792_v57  ;;  %v1227_v28 = vld [vmem:[#allocation2 + $0xad0] sm:$0xff]  ;;  %v1222_v36 = vld [vmem:[#allocation2 + $0xaa8] sm:$0xff] }
 0x176   :  { %842 = vmatprep.subr.mxu1 %v732_v40  ;;  %978 = vmatprep.subr.mxu0 %v2716_v0 }
 0x177   :  { %843 = vmatpush2.msra.mxu1 %v731_v41  ;;  %979 = vmatpush1.msra.mxu0 %v930_v29  ;;  %v1226_v29 = vld [vmem:[#allocation2 + $0xac8] sm:$0xff] }
 0x178   :  { %844 = vmatprep.subr.mxu1 %v730_v42  ;;  %980 = vmatprep.subr.mxu0 %v2716_v0 }
 0x179   :  { %845 = vmatpush2.msra.mxu1 %v729_v43  ;;  %981 = vmatpush1.msra.mxu0 %v929_v30  ;;  %v1228_v30 = vld [vmem:[#allocation2 + $0xad8] sm:$0xff] }
 0x17a   :  { %846 = vmatprep.subr.mxu1 %v728_v44  ;;  %982 = vmatprep.subr.mxu0 %v2716_v0 }
 0x17b   :  { %847 = vmatpush2.msra.mxu1 %v727_v45  ;;  %983 = vmatpush1.msra.mxu0 %v928_v31  ;;  %v1224_v31 = vld [vmem:[#allocation2 + $0xab8] sm:$0xff] }
 0x17c   :  { %879 = vmatprep.subr.mxu1 %v766_v46  ;;  %1008 = vmatprep.subr.mxu0 %v2716_v0 }
 0x17d   :  { %1009 = vmatpush2.msra.mxu0 %v947_v32  ;;  %v1223_v32 = vld [vmem:[#allocation2 + $0xab0] sm:$0xff] }
 0x17e   :  { %1010 = vmatprep.subr.mxu0 %v2716_v0 }
 0x17f   :  { %1011 = vmatpush2.msra.mxu0 %v946_v33  ;;  %v1225_v33 = vld [vmem:[#allocation2 + $0xac0] sm:$0xff] }
 0x180   :  { %1012 = vmatprep.subr.mxu0 %v2716_v0 }
 0x181   :  { %1013 = vmatpush2.msra.mxu0 %v945_v34  ;;  %v1221_v34 = vld [vmem:[#allocation2 + $0xaa0] sm:$0xff] }
 0x182   :  { %1014 = vmatprep.subr.mxu0 %v2716_v0 }
 0x183   :  { %1015 = vmatpush2.msra.mxu0 %v944_v35  ;;  %v1220_v35 = vld [vmem:[#allocation2 + $0xa98] sm:$0xff] }
 0x184   :  { %2537 = vmatprep.subr.mxu0 %v2716_v0 }
 0x1d6   :  { %v546_v52 = vpop.f32.mrf.mxu1 }
 0x1d8   :  { %v548_v60 = vpop.f32.mrf.mxu1 }
 0x1d9   :  { %v475_v53 = vpop.f32.mrf.mxu0 }
 0x1da   :  { %v476_v55 = vadd.f32 %v475_v53, %v393_v50 }
 0x1db   :  { %v477_v58 = vpop.f32.mrf.mxu0 }
 0x1dc   :  { %v478_v59 = vadd.f32 %v477_v58, %v397_v51  ;;  %v547_v61 = vadd.f32 %v546_v52, %v476_v55  ;;  %v1036_v58 = vld [vmem:[#allocation6 + $0x8] sm:$0xff] }
 0x1de   :  { %v549_v62 = vadd.f32 %v548_v60, %v478_v59  ;;  %v691_v1 = vmax.f32 %v547_v61, 0.0  ;;  %v1035_v59 = vld [vmem:[#allocation6] sm:$0xff]  ;;  %v1037_v61 = vld [vmem:[#allocation6 + $0x10] sm:$0xff] }
 0x1e0   :  { %v692_v63 = vmax.f32 %v549_v62, 0.0 }
 0x1e2   :  { %848 = vmatprep.mubr.f32.mxu1 %v692_v63  ;;  %v2621_v63 = vld [vmem:[%s2986_s0] sm:$0xff] }
 0x1e3   :  { %849 = vmatmul.mubr.f32.vlgmr.msra.gmra.mxu1 %v691_v1 }
 0x1e4   :  { %880 = vmatpush1.msra.mxu1 %v765_v2  ;;  %919 = vmatprep.mubr.f32.mxu1 %v2716_v0  ;;  %v1251_v2 = vld [vmem:[#allocation2 + $0xb90] sm:$0xff] }
 0x1e5   :  { %881 = vmatprep.subr.mxu1 %v764_v3 }
 0x1e6   :  { %882 = vmatpush1.msra.mxu1 %v763_v4 }
 0x1e7   :  { %883 = vmatprep.subr.mxu1 %v762_v5  ;;  %v1250_v5 = vld [vmem:[#allocation2 + $0xb88] sm:$0xff] }
 0x1e8   :  { %884 = vmatpush1.msra.mxu1 %v761_v6  ;;  %v1252_v6 = vld [vmem:[#allocation2 + $0xb98] sm:$0xff] }
 0x1e9   :  { %885 = vmatprep.subr.mxu1 %v760_v7  ;;  %v1248_v7 = vld [vmem:[#allocation2 + $0xb78] sm:$0xff] }
 0x1ea   :  { %886 = vmatpush1.msra.mxu1 %v759_v8  ;;  %v1247_v8 = vld [vmem:[#allocation2 + $0xb70] sm:$0xff] }
 0x1eb   :  { %1090 = vmatprep.subr.mxu1 %v1036_v58  ;;  %v1260_v58 = vld [vmem:[#allocation2 + $0xbd8] sm:$0xff] }
 0x1f6   :  { %v2388_v9 = vpop.f32.mrf.mxu1 }
 0x1f8   :  { %v2389_v11 = vpop.f32.mrf.mxu1 }
 0x1f9   :  { %v2390_v12 = vadd.f32 %v2389_v11, %v2388_v9  ;;  %v1249_v9 = vld [vmem:[#allocation2 + $0xb80] sm:$0xff]  ;;  %v1244_v11 = vld [vmem:[#allocation2 + $0xb58] sm:$0xff] }
 0x1fb   :  { %v618_v13 = vadd.f32 %v2390_v12, %v401_v10  ;;  %v1245_v10 = vld [vmem:[#allocation2 + $0xb60] sm:$0xff]  ;;  %v1246_v12 = vld [vmem:[#allocation2 + $0xb68] sm:$0xff] }
 0x1fc   :  { %v687_v14 = vpop.f32.mrf.mxu1 }
 0x1fd   :  { %v688_v15 = vadd.f32 %v687_v14, %v618_v13  ;;  %v1242_v13 = vld [vmem:[#allocation2 + $0xb48] sm:$0xff]  ;;  %v1241_v14 = vld [vmem:[#allocation2 + $0xb40] sm:$0xff] }
 0x1fe   :  { %v2536_v16 = vpop.f32.mrf.mxu1 }
 0x1ff   :  { %v693_v17 = vmax.f32 %v688_v15, 0.0  ;;  %v1243_v15 = vld [vmem:[#allocation2 + $0xb50] sm:$0xff] }
 0x200   :  { %v1239_v16 = vld [vmem:[#allocation2 + $0xb30] sm:$0xff] }
 0x201   :  { %2329 = vmatmul.mubr.msk.f32.vlgmr.msra.gmra.mxu1 %vm780_vm3, %v693_v17  ;;  %v1238_v17 = vld [vmem:[#allocation2 + $0xb28] sm:$0xff] }
 0x202   :  { %1124 = vmatprep.mubr.f32.mxu1 %v2716_v0  ;;  %1091 = vmatpush1.msra.mxu1 %v1035_v59  ;;  %v1259_v59 = vld [vmem:[#allocation2 + $0xbd0] sm:$0xff] }
 0x203   :  { %1286 = vmatprep.subr.mxu1 %v1251_v2  ;;  %v1253_v2 = vld [vmem:[#allocation2 + $0xba0] sm:$0xff] }
 0x2a3   :  { %v850_v37 = vpop.f32.mrf.mxu1 }
 0x2a4   :  { %v851_v41 = vadd.f32 %v850_v37, %v773_v38  ;;  %v1218_v37 = vld [vmem:[#allocation2 + $0xa88] sm:$0xff]  ;;  %v1217_v38 = vld [vmem:[#allocation2 + $0xa80] sm:$0xff] }
 0x2a5   :  { %v852_v40 = vpop.f32.mrf.mxu1 }
 0x2a6   :  { %v853_v43 = vadd.f32 %v852_v40, %v777_v39  ;;  %v1219_v39 = vld [vmem:[#allocation2 + $0xa90] sm:$0xff] }
 0x2a7   :  { %v1215_v40 = vld [vmem:[#allocation2 + $0xa70] sm:$0xff] }
 0x2c1   :  { %v921_v42 = vpop.f32.mrf.mxu1 }
 0x2c2   :  { %v922_v44 = vadd.f32 %v921_v42, %v851_v41  ;;  %v1214_v41 = vld [vmem:[#allocation2 + $0xa68] sm:$0xff]  ;;  %v1216_v42 = vld [vmem:[#allocation2 + $0xa78] sm:$0xff] }
 0x2c3   :  { %v923_v45 = vpop.f32.mrf.mxu1 }
 0x2c4   :  { %v924_v46 = vadd.f32 %v923_v45, %v853_v43  ;;  %v926_v48 = vmax.f32 %v922_v44, 0.0  ;;  %v1212_v43 = vld [vmem:[#allocation2 + $0xa58] sm:$0xff]  ;;  %v1211_v44 = vld [vmem:[#allocation2 + $0xa50] sm:$0xff]  ;;  %v1213_v45 = vld [vmem:[#allocation2 + $0xa60] sm:$0xff] }
 0x2c6   :  { %v927_v47 = vmax.f32 %v924_v46, 0.0  ;;  %v1209_v46 = vld [vmem:[#allocation2 + $0xa40] sm:$0xff] }
 0x2c8   :  { %2330 = vmatprep.mubr.msk.f32.mxu0 %vm780_vm3, %v927_v47  ;;  %v1208_v47 = vld [vmem:[#allocation2 + $0xa38] sm:$0xff] }
 0x2c9   :  { %1017 = vmatmul.mubr.f32.vlgmr.msra.gmra.mxu0 %v926_v48  ;;  %v1210_v48 = vld [vmem:[#allocation2 + $0xa48] sm:$0xff] }
 0x2ca   :  { %2539 = vmatprep.mubr.msk.f32.mxu0 %vm2717_vm0, %v2716_v0  ;;  %2538 = vmatpush3.msra.mxu0 %v1037_v61  ;;  %v1257_v61 = vld [vmem:[#allocation2 + $0xbc0] sm:$0xff] }
 0x2cb   :  { %1357 = vmatprep.subr.mxu0 %v2716_v0 }
 0x389   :  { %v1018_v50 = vpop.f32.mrf.mxu0 }
 0x38a   :  { %v1019_v51 = vadd.f32 %v1018_v50, %v948_v49  ;;  %v1206_v49 = vld [vmem:[#allocation2 + $0xa28] sm:$0xff]  ;;  %v1205_v50 = vld [vmem:[#allocation2 + $0xa20] sm:$0xff] }
 0x38b   :  { %v1020_v52 = vpop.f32.mrf.mxu0 }
 0x38c   :  { %v1022_v53 = vmul.f32 0.5, %v1019_v51  ;;  %2308 = vst.msk [vmem:[%s2991_s5 + $0x8] sm:$0xff] %vm1056_vm4, %v1019_v51  ;;  %v1263_v52 = vld [vmem:[#allocation2 + $0xbf0] sm:$0xff] }
 0x38d   :  { %2310 = vst.msk [vmem:[%s2991_s5 + $0x8] sm:$0xff] %vm2309_vm5, %v1019_v51 }
 0x38e   :  { %v1023_v55 = vmul.f32 1.442695, %v1022_v53  ;;  %v1262_v53 = vld [vmem:[#allocation2 + $0xbe8] sm:$0xff] }
 0x390   :  { %2619 = vpow2.f32 %v1023_v55  ;;  %v1264_v55 = vld [vmem:[#allocation2 + $0xbf8] sm:$0xff] }
 0x39d   :  { %v2620_v60 = vpop.eup %2619 }
 0x39e   :  { %1026 = vrot.lane.b32.xlu0 %v2620_v60, %s2718_s19  ;;  %v1261_v60 = vld [vmem:[#allocation2 + $0xbe0] sm:$0xff] }
 0x410   :  { %v1027_v62 = vpop.permute.xlu0 %1026 }
 0x411   :  { %v1029_v1 = vmul.f32 %v2621_v63, %v1027_v62  ;;  %v1256_v62 = vld [vmem:[#allocation2 + $0xbb8] sm:$0xff]  ;;  %v1258_v63 = vld [vmem:[#allocation2 + $0xbc8] sm:$0xff] }
 0x413   :  { %1031 = vrot.lane.b32.xlu0 %v1029_v1, %s2710_s22  ;;  %v1254_v1 = vld [vmem:[#allocation2 + $0xba8] sm:$0xff] }
 0x485   :  { %v1032_v3 = vpop.permute.xlu0 %1031 }
 0x486   :  { %v1034_v4 = vadd.f32 %v1032_v3, %v1019_v51  ;;  %v1207_v51 = vld [vmem:[#allocation2 + $0xa30] sm:$0xff] }
 0x487   :  { %v1255_v3 = vld [vmem:[#allocation2 + $0xbb0] sm:$0xff] }
 0x488   :  { %2311 = vrot.lane.b32.xlu0 %v1034_v4, %s2710_s22  ;;  %2331 = vmatmul.mubr.msk.f32.vlgmr.msra.gmra.mxu1 %vm1056_vm4, %v1034_v4 }
 0x489   :  { %2540 = vmatmul.mubr.msk.f32.vlgmr.msra.gmra.mxu0 %vm1056_vm4, %v1034_v4  ;;  %1287 = vmatpush1.msra.mxu1 %v1250_v5  ;;  %v1039_v5 = vld [vmem:[#allocation7 + $0x4] ss:$8 sm:$0x7] }
 0x48a   :  { %1358 = vmatpush1.msra.mxu0 %v1252_v6  ;;  %1288 = vmatprep.subr.mxu1 %v1248_v7  ;;  %v1044_v6 = vrot.slane %v1039_v5, %v2790_v56  ;;  %v1477_v7 = vld [vmem:[#allocation2 + $0xef0] sm:$0xff] }
 0x48b   :  { %1359 = vmatprep.subr.mxu0 %v2716_v0  ;;  %1289 = vmatpush1.msra.mxu1 %v1247_v8  ;;  %v1048_v8 = vrot.slane %v1039_v5, %v2792_v57 }
 0x48c   :  { %1360 = vmatpush1.msra.mxu0 %v1249_v9  ;;  %1290 = vmatprep.subr.mxu1 %v1245_v10  ;;  %v1052_v10 = vrot.slane %v1039_v5, %v2788_v54  ;;  %v1510_v5 = vld [vmem:[#allocation2 + $0xff8] sm:$0xff] }
 0x48d   :  { %1361 = vmatprep.subr.mxu0 %v2716_v0  ;;  %1291 = vmatpush1.msra.mxu1 %v1244_v11 }
 0x48e   :  { %1362 = vmatpush1.msra.mxu0 %v1246_v12  ;;  %1292 = vmatprep.subr.mxu1 %v1242_v13 }
 0x48f   :  { %1363 = vmatprep.subr.mxu0 %v2716_v0  ;;  %1293 = vmatpush1.msra.mxu1 %v1241_v14 }
 0x490   :  { %1364 = vmatpush1.msra.mxu0 %v1243_v15  ;;  %1294 = vmatprep.subr.mxu1 %v1239_v16 }
 0x491   :  { %1365 = vmatprep.subr.mxu0 %v2716_v0  ;;  %1295 = vmatpush1.msra.mxu1 %v1238_v17 }
 0x492   :  { %1366 = vmatpush1.msra.mxu0 %v1240_v18  ;;  %1296 = vmatprep.subr.mxu1 %v1236_v19  ;;  %v1476_v19 = vld [vmem:[#allocation2 + $0xee8] sm:$0xff] }
 0x493   :  { %1367 = vmatprep.subr.mxu0 %v2716_v0  ;;  %1297 = vmatpush1.msra.mxu1 %v1235_v20  ;;  %v1474_v20 = vld [vmem:[#allocation2 + $0xed8] sm:$0xff] }
 0x494   :  { %1368 = vmatpush1.msra.mxu0 %v1237_v21  ;;  %1298 = vmatprep.subr.mxu1 %v1233_v22  ;;  %v1473_v21 = vld [vmem:[#allocation2 + $0xed0] sm:$0xff] }
 0x495   :  { %1369 = vmatprep.subr.mxu0 %v2716_v0  ;;  %1299 = vmatpush1.msra.mxu1 %v1232_v23  ;;  %v1471_v23 = vld [vmem:[#allocation2 + $0xec0] sm:$0xff] }
 0x496   :  { %1370 = vmatpush1.msra.mxu0 %v1234_v24  ;;  %1300 = vmatprep.subr.mxu1 %v1230_v25  ;;  %v1470_v24 = vld [vmem:[#allocation2 + $0xeb8] sm:$0xff]  ;;  %v1468_v25 = vld [vmem:[#allocation2 + $0xea8] sm:$0xff] }
 0x497   :  { %1371 = vmatprep.subr.mxu0 %v2716_v0  ;;  %1301 = vmatpush1.msra.mxu1 %v1229_v26  ;;  %v1467_v26 = vld [vmem:[#allocation2 + $0xea0] sm:$0xff] }
 0x498   :  { %1372 = vmatpush1.msra.mxu0 %v1231_v27  ;;  %1302 = vmatprep.subr.mxu1 %v1227_v28  ;;  %v1465_v27 = vld [vmem:[#allocation2 + $0xe90] sm:$0xff]  ;;  %v1464_v28 = vld [vmem:[#allocation2 + $0xe88] sm:$0xff] }
 0x499   :  { %1373 = vmatprep.subr.mxu0 %v2716_v0  ;;  %1303 = vmatpush1.msra.mxu1 %v1226_v29  ;;  %v1462_v29 = vld [vmem:[#allocation2 + $0xe78] sm:$0xff] }
 0x49a   :  { %1374 = vmatpush1.msra.mxu0 %v1228_v30  ;;  %1304 = vmatprep.subr.mxu1 %v1224_v31  ;;  %v1537_v30 = vld [vmem:[#allocation2 + $0x10d0] sm:$0xff] }
 0x49b   :  { %1375 = vmatprep.subr.mxu0 %v2716_v0  ;;  %1305 = vmatpush1.msra.mxu1 %v1223_v32  ;;  %v1461_v31 = vld [vmem:[#allocation2 + $0xe70] sm:$0xff]  ;;  %v1536_v32 = vld [vmem:[#allocation2 + $0x10c8] sm:$0xff] }
 0x49c   :  { %1376 = vmatpush1.msra.mxu0 %v1225_v33  ;;  %1306 = vmatprep.subr.mxu1 %v1221_v34  ;;  %v1459_v33 = vld [vmem:[#allocation2 + $0xe60] sm:$0xff]  ;;  %v1534_v34 = vld [vmem:[#allocation2 + $0x10b8] sm:$0xff] }
 0x49d   :  { %1377 = vmatprep.subr.mxu0 %v2716_v0  ;;  %1307 = vmatpush1.msra.mxu1 %v1220_v35  ;;  %v1533_v35 = vld [vmem:[#allocation2 + $0x10b0] sm:$0xff] }
 0x49e   :  { %1378 = vmatpush1.msra.mxu0 %v1222_v36  ;;  %1308 = vmatprep.subr.mxu1 %v1218_v37  ;;  %v1458_v36 = vld [vmem:[#allocation2 + $0xe58] sm:$0xff]  ;;  %v1456_v37 = vld [vmem:[#allocation2 + $0xe48] sm:$0xff] }
 0x49f   :  { %1379 = vmatprep.subr.mxu0 %v2716_v0  ;;  %1309 = vmatpush1.msra.mxu1 %v1217_v38  ;;  %v1455_v38 = vld [vmem:[#allocation2 + $0xe40] sm:$0xff] }
 0x4a0   :  { %1380 = vmatpush1.msra.mxu0 %v1219_v39  ;;  %1310 = vmatprep.subr.mxu1 %v1215_v40  ;;  %v1453_v39 = vld [vmem:[#allocation2 + $0xe30] sm:$0xff]  ;;  %v1452_v40 = vld [vmem:[#allocation2 + $0xe28] sm:$0xff] }
 0x4a1   :  { %1381 = vmatprep.subr.mxu0 %v2716_v0  ;;  %1311 = vmatpush1.msra.mxu1 %v1214_v41  ;;  %v1450_v41 = vld [vmem:[#allocation2 + $0xe18] sm:$0xff] }
 0x4a2   :  { %1382 = vmatpush1.msra.mxu0 %v1216_v42  ;;  %1312 = vmatprep.subr.mxu1 %v1212_v43  ;;  %v1449_v42 = vld [vmem:[#allocation2 + $0xe10] sm:$0xff]  ;;  %v1447_v43 = vld [vmem:[#allocation2 + $0xe00] sm:$0xff] }
 0x4a3   :  { %1383 = vmatprep.subr.mxu0 %v2716_v0  ;;  %1313 = vmatpush1.msra.mxu1 %v1211_v44  ;;  %v1446_v44 = vld [vmem:[#allocation2 + $0xdf8] sm:$0xff] }
 0x4a4   :  { %1384 = vmatpush1.msra.mxu0 %v1213_v45  ;;  %1314 = vmatprep.subr.mxu1 %v1209_v46  ;;  %v1444_v45 = vld [vmem:[#allocation2 + $0xde8] sm:$0xff]  ;;  %v1443_v46 = vld [vmem:[#allocation2 + $0xde0] sm:$0xff] }
 0x4a5   :  { %1385 = vmatprep.subr.mxu0 %v2716_v0  ;;  %1315 = vmatpush1.msra.mxu1 %v1208_v47  ;;  %v1441_v47 = vld [vmem:[#allocation2 + $0xdd0] sm:$0xff] }
 0x4a6   :  { %1386 = vmatpush1.msra.mxu0 %v1210_v48  ;;  %1316 = vmatprep.subr.mxu1 %v1206_v49  ;;  %v1440_v48 = vld [vmem:[#allocation2 + $0xdc8] sm:$0xff]  ;;  %v1438_v49 = vld [vmem:[#allocation2 + $0xdb8] sm:$0xff] }
 0x4a7   :  { %1387 = vmatprep.subr.mxu0 %v2716_v0  ;;  %1317 = vmatpush1.msra.mxu1 %v1205_v50  ;;  %v1437_v50 = vld [vmem:[#allocation2 + $0xdb0] sm:$0xff] }
 0x4a8   :  { %1388 = vmatpush1.msra.mxu0 %v1207_v51  ;;  %1342 = vmatprep.subr.mxu1 %v1263_v52  ;;  %v1435_v51 = vld [vmem:[#allocation2 + $0xda0] sm:$0xff]  ;;  %v1434_v52 = vld [vmem:[#allocation2 + $0xd98] sm:$0xff] }
 0x4a9   :  { %1413 = vmatprep.subr.mxu0 %v2716_v0  ;;  %1343 = vmatpush2.msra.mxu1 %v1262_v53  ;;  %v1432_v53 = vld [vmem:[#allocation2 + $0xd88] sm:$0xff] }
 0x4aa   :  { %1414 = vmatpush2.msra.mxu0 %v1264_v55  ;;  %1344 = vmatprep.subr.mxu1 %v1260_v58  ;;  %v1431_v55 = vld [vmem:[#allocation2 + $0xd80] sm:$0xff]  ;;  %v1525_v58 = vld [vmem:[#allocation2 + $0x1070] sm:$0xff] }
 0x4ab   :  { %1415 = vmatprep.subr.mxu0 %v2716_v0  ;;  %1345 = vmatpush2.msra.mxu1 %v1259_v59  ;;  %v1524_v59 = vld [vmem:[#allocation2 + $0x1068] sm:$0xff] }
 0x4ac   :  { %1416 = vmatpush2.msra.mxu0 %v1261_v60  ;;  %1346 = vmatprep.subr.mxu1 %v1257_v61  ;;  %v1522_v60 = vld [vmem:[#allocation2 + $0x1058] sm:$0xff]  ;;  %v1521_v61 = vld [vmem:[#allocation2 + $0x1050] sm:$0xff] }
 0x4ad   :  { %1417 = vmatprep.subr.mxu0 %v2716_v0  ;;  %1347 = vmatpush2.msra.mxu1 %v1256_v62  ;;  %v1519_v62 = vld [vmem:[#allocation2 + $0x1040] sm:$0xff] }
 0x4ae   :  { %1418 = vmatpush2.msra.mxu0 %v1258_v63  ;;  %1348 = vmatprep.subr.mxu1 %v1254_v1  ;;  %v1518_v63 = vld [vmem:[#allocation2 + $0x1038] sm:$0xff]  ;;  %v1516_v1 = vld [vmem:[#allocation2 + $0x1028] sm:$0xff] }
 0x4af   :  { %1419 = vmatprep.subr.mxu0 %v2716_v0  ;;  %1349 = vmatpush2.msra.mxu1 %v1253_v2  ;;  %v1515_v2 = vld [vmem:[#allocation2 + $0x1020] sm:$0xff] }
 0x4b0   :  { %1420 = vmatpush2.msra.mxu0 %v1255_v3  ;;  %1560 = vmatprep.subr.mxu1 %v1477_v7  ;;  %v1513_v3 = vld [vmem:[#allocation2 + $0x1010] sm:$0xff]  ;;  %v1507_v7 = vld [vmem:[#allocation2 + $0xfe0] sm:$0xff] }
 0x4b1   :  { %1655 = vmatprep.subr.mxu0 %v1537_v30  ;;  %v1480_v30 = vld [vmem:[#allocation2 + $0xf08] sm:$0xff] }
 0x4fa   :  { %v2312_v4 = vpop.permute.xlu0 %2311 }
 0x4fb   :  { %2315 = vst.msk [vmem:[%s2991_s5 + $0x8] sm:$0xff] %vm2314_vm6, %v2312_v4  ;;  %v1512_v4 = vld [vmem:[#allocation2 + $0x1008] sm:$0xff] }
 0x4fc   :  { %2317 = vst.msk [vmem:[%s2991_s5 + $0x8] sm:$0xff] %vm2316_vm7, %v2716_v0 }
 0x548   :  { %v1126_v9 = vpop.f32.mrf.mxu1 }
 0x549   :  { %v1197_v11 = vpop.f32.mrf.mxu0  ;;  %v1127_v12 = vadd.f32 %v1126_v9, %v1044_v6  ;;  %v1509_v6 = vld [vmem:[#allocation2 + $0xff0] sm:$0xff]  ;;  %v1504_v9 = vld [vmem:[#allocation2 + $0xfc8] sm:$0xff] }
 0x54a   :  { %v1128_v13 = vpop.f32.mrf.mxu1  ;;  %v1198_v16 = vadd.f32 %v1197_v11, %v1052_v10  ;;  %v1503_v10 = vld [vmem:[#allocation2 + $0xfc0] sm:$0xff]  ;;  %v1501_v11 = vld [vmem:[#allocation2 + $0xfb0] sm:$0xff] }
 0x54b   :  { %v1129_v14 = vadd.f32 %v1128_v13, %v1048_v8  ;;  %v2541_v15 = vpop.f32.mrf.mxu0  ;;  %v1201_v18 = vmax.f32 %v1127_v12, 0.0  ;;  %v1506_v8 = vld [vmem:[#allocation2 + $0xfd8] sm:$0xff]  ;;  %v1500_v12 = vld [vmem:[#allocation2 + $0xfa8] sm:$0xff] }
 0x54c   :  { %v1203_v22 = vmax.f32 %v1198_v16, 0.0  ;;  %v1498_v13 = vld [vmem:[#allocation2 + $0xf98] sm:$0xff]  ;;  %v1495_v15 = vld [vmem:[#allocation2 + $0xf80] sm:$0xff] }
 0x54d   :  { %v1202_v17 = vmax.f32 %v1129_v14, 0.0  ;;  %v1497_v14 = vld [vmem:[#allocation2 + $0xf90] sm:$0xff]  ;;  %v1494_v16 = vld [vmem:[#allocation2 + $0xf78] sm:$0xff] }
 0x54f   :  { %2049 = vrot.lane.b32.xlu1 %v1202_v17, %s2719_s25  ;;  %2333 = vmatprep.mubr.msk.f32.mxu1 %vm780_vm3, %v1202_v17 }
 0x550   :  { %2334 = vmatprep.mubr.msk.f32.mxu0 %vm780_vm3, %v1202_v17  ;;  %1351 = vmatmul.mubr.f32.vlgmr.msra.gmra.mxu1 %v1201_v18  ;;  %v1492_v17 = vld [vmem:[#allocation2 + $0xf68] sm:$0xff] }
 0x551   :  { %1422 = vmatmul.mubr.f32.vlgmr.msra.gmra.mxu0 %v1201_v18  ;;  %1561 = vmatpush1.msra.mxu1 %v1476_v19  ;;  %v1491_v18 = vld [vmem:[#allocation2 + $0xf60] sm:$0xff]  ;;  %v1489_v19 = vld [vmem:[#allocation2 + $0xf50] sm:$0xff] }
 0x552   :  { %1562 = vmatprep.subr.mxu1 %v1474_v20  ;;  %1695 = vmatprep.mubr.f32.mxu0 %v2716_v0  ;;  %v1531_v20 = vld [vmem:[#allocation2 + $0x10a0] sm:$0xff] }
 0x553   :  { %2051 = vrot.lane.b32.xlu1 %v1203_v22, %s2719_s25  ;;  %1563 = vmatpush1.msra.mxu1 %v1473_v21  ;;  %v1488_v21 = vld [vmem:[#allocation2 + $0xf48] sm:$0xff]  ;;  %v1530_v22 = vld [vmem:[#allocation2 + $0x1098] sm:$0xff] }
 0x554   :  { %1564 = vmatprep.subr.mxu1 %v1471_v23  ;;  %1656 = vmatpush1.msra.mxu0 %v1536_v32  ;;  %v1486_v23 = vld [vmem:[#allocation2 + $0xf38] sm:$0xff] }
 0x555   :  { %1565 = vmatpush1.msra.mxu1 %v1470_v24  ;;  %1657 = vmatprep.subr.mxu0 %v1534_v34  ;;  %v1528_v24 = vld [vmem:[#allocation2 + $0x1088] sm:$0xff] }
 0x556   :  { %1566 = vmatprep.subr.mxu1 %v1468_v25  ;;  %1658 = vmatpush1.msra.mxu0 %v1533_v35  ;;  %v1485_v25 = vld [vmem:[#allocation2 + $0xf30] sm:$0xff]  ;;  %v1266_v32 = vld [vmem:[#allocation7 + $0x5] ss:$8 sm:$0x7] }
 0x557   :  { %1567 = vmatpush1.msra.mxu1 %v1467_v26  ;;  %1659 = vmatprep.subr.mxu0 %v1531_v20  ;;  %v1527_v26 = vld [vmem:[#allocation2 + $0x1080] sm:$0xff]  ;;  %v1271_v34 = vrot.slane %v1266_v32, %v2790_v56  ;;  %v1275_v35 = vrot.slane %v1266_v32, %v2792_v57  ;;  %v1529_v20 = vld [vmem:[#allocation2 + $0x1090] sm:$0xff] }
 0x558   :  { %1568 = vmatprep.subr.mxu1 %v1465_v27  ;;  %1660 = vmatpush1.msra.mxu0 %v1530_v22  ;;  %v1483_v27 = vld [vmem:[#allocation2 + $0xf20] sm:$0xff]  ;;  %v1861_v22 = vld [vmem:[#allocation2 + $0x1248] sm:$0xff] }
 0x559   :  { %1569 = vmatpush1.msra.mxu1 %v1464_v28  ;;  %1661 = vmatprep.subr.mxu0 %v1528_v24  ;;  %v1526_v28 = vld [vmem:[#allocation2 + $0x1078] sm:$0xff]  ;;  %v1860_v24 = vld [vmem:[#allocation2 + $0x1230] sm:$0xff] }
 0x55a   :  { %1570 = vmatprep.subr.mxu1 %v1462_v29  ;;  %1662 = vmatpush1.msra.mxu0 %v1527_v26  ;;  %v1482_v29 = vld [vmem:[#allocation2 + $0xf18] sm:$0xff] }
 0x55b   :  { %1571 = vmatpush1.msra.mxu1 %v1461_v31  ;;  %2397 = vmatprep.subr.mxu0 %v1526_v28  ;;  %v1479_v31 = vld [vmem:[#allocation2 + $0xf00] sm:$0xff]  ;;  %v1859_v26 = vld [vmem:[#allocation2 + $0x1218] sm:$0xff] }
 0x55c   :  { %1572 = vmatprep.subr.mxu1 %v1459_v33  ;;  %v1279_v33 = vrot.slane %v1266_v32, %v2788_v54  ;;  %v1858_v28 = vld [vmem:[#allocation2 + $0x1200] sm:$0xff]  ;;  %v1856_v32 = vld [vmem:[#allocation2 + $0x11d0] sm:$0xff] }
 0x55d   :  { %1573 = vmatpush1.msra.mxu1 %v1458_v36 }
 0x55e   :  { %1574 = vmatprep.subr.mxu1 %v1456_v37 }
 0x55f   :  { %1575 = vmatpush1.msra.mxu1 %v1455_v38 }
 0x560   :  { %1576 = vmatprep.subr.mxu1 %v1453_v39 }
 0x561   :  { %1577 = vmatpush1.msra.mxu1 %v1452_v40 }
 0x562   :  { %1578 = vmatprep.subr.mxu1 %v1450_v41 }
 0x563   :  { %1579 = vmatpush1.msra.mxu1 %v1449_v42 }
 0x564   :  { %1580 = vmatprep.subr.mxu1 %v1447_v43 }
 0x565   :  { %1581 = vmatpush1.msra.mxu1 %v1446_v44  ;;  %v1478_v44 = vld [vmem:[#allocation2 + $0xef8] sm:$0xff] }
 0x566   :  { %1582 = vmatprep.subr.mxu1 %v1444_v45 }
 0x567   :  { %1583 = vmatpush1.msra.mxu1 %v1443_v46  ;;  %v1523_v46 = vld [vmem:[#allocation2 + $0x1060] sm:$0xff] }
 0x568   :  { %1584 = vmatprep.subr.mxu1 %v1441_v47  ;;  %v1475_v47 = vld [vmem:[#allocation2 + $0xee0] sm:$0xff] }
 0x569   :  { %1585 = vmatpush1.msra.mxu1 %v1440_v48 }
 0x56a   :  { %1586 = vmatprep.subr.mxu1 %v1438_v49  ;;  %v1520_v49 = vld [vmem:[#allocation2 + $0x1048] sm:$0xff] }
 0x56b   :  { %1587 = vmatpush1.msra.mxu1 %v1437_v50  ;;  %v1472_v50 = vld [vmem:[#allocation2 + $0xec8] sm:$0xff] }
 0x56c   :  { %1588 = vmatprep.subr.mxu1 %v1435_v51  ;;  %v1517_v51 = vld [vmem:[#allocation2 + $0x1030] sm:$0xff] }
 0x56d   :  { %1589 = vmatpush1.msra.mxu1 %v1434_v52  ;;  %v1469_v52 = vld [vmem:[#allocation2 + $0xeb0] sm:$0xff] }
 0x56e   :  { %1590 = vmatprep.subr.mxu1 %v1432_v53  ;;  %v1514_v53 = vld [vmem:[#allocation2 + $0x1018] sm:$0xff] }
 0x56f   :  { %1591 = vmatpush1.msra.mxu1 %v1431_v55  ;;  %v1466_v55 = vld [vmem:[#allocation2 + $0xe98] sm:$0xff] }
 0x570   :  { %1592 = vmatprep.subr.mxu1 %v1525_v58  ;;  %v1511_v58 = vld [vmem:[#allocation2 + $0x1000] sm:$0xff] }
 0x571   :  { %1593 = vmatpush2.msra.mxu1 %v1524_v59  ;;  %v1463_v59 = vld [vmem:[#allocation2 + $0xe80] sm:$0xff] }
 0x572   :  { %1594 = vmatprep.subr.mxu1 %v1522_v60  ;;  %v1508_v60 = vld [vmem:[#allocation2 + $0xfe8] sm:$0xff] }
 0x573   :  { %1595 = vmatpush2.msra.mxu1 %v1521_v61  ;;  %v1460_v61 = vld [vmem:[#allocation2 + $0xe68] sm:$0xff] }
 0x574   :  { %1596 = vmatprep.subr.mxu1 %v1519_v62  ;;  %v1505_v62 = vld [vmem:[#allocation2 + $0xfd0] sm:$0xff] }
 0x575   :  { %1597 = vmatpush2.msra.mxu1 %v1518_v63  ;;  %v1457_v63 = vld [vmem:[#allocation2 + $0xe50] sm:$0xff] }
 0x576   :  { %1598 = vmatprep.subr.mxu1 %v1516_v1  ;;  %v1502_v1 = vld [vmem:[#allocation2 + $0xfb8] sm:$0xff] }
 0x577   :  { %1599 = vmatpush2.msra.mxu1 %v1515_v2  ;;  %v1454_v2 = vld [vmem:[#allocation2 + $0xe38] sm:$0xff] }
 0x578   :  { %1600 = vmatprep.subr.mxu1 %v1513_v3  ;;  %v1499_v3 = vld [vmem:[#allocation2 + $0xfa0] sm:$0xff] }
 0x579   :  { %1601 = vmatpush2.msra.mxu1 %v1512_v4  ;;  %v1451_v4 = vld [vmem:[#allocation2 + $0xe20] sm:$0xff] }
 0x57a   :  { %1602 = vmatprep.subr.mxu1 %v1510_v5  ;;  %v1496_v5 = vld [vmem:[#allocation2 + $0xf88] sm:$0xff] }
 0x57b   :  { %1603 = vmatpush2.msra.mxu1 %v1509_v6  ;;  %v1448_v6 = vld [vmem:[#allocation2 + $0xe08] sm:$0xff] }
 0x57c   :  { %1604 = vmatprep.subr.mxu1 %v1507_v7  ;;  %v1493_v7 = vld [vmem:[#allocation2 + $0xf70] sm:$0xff] }
 0x57d   :  { %1605 = vmatpush2.msra.mxu1 %v1506_v8  ;;  %v1445_v8 = vld [vmem:[#allocation2 + $0xdf0] sm:$0xff] }
 0x57e   :  { %1606 = vmatprep.subr.mxu1 %v1504_v9  ;;  %v1490_v9 = vld [vmem:[#allocation2 + $0xf58] sm:$0xff] }
 0x57f   :  { %1607 = vmatpush2.msra.mxu1 %v1503_v10  ;;  %v1442_v10 = vld [vmem:[#allocation2 + $0xdd8] sm:$0xff] }
 0x580   :  { %1608 = vmatprep.subr.mxu1 %v1501_v11  ;;  %v1487_v11 = vld [vmem:[#allocation2 + $0xf40] sm:$0xff] }
 0x581   :  { %1609 = vmatpush2.msra.mxu1 %v1500_v12  ;;  %v1439_v12 = vld [vmem:[#allocation2 + $0xdc0] sm:$0xff] }
 0x582   :  { %1610 = vmatprep.subr.mxu1 %v1498_v13  ;;  %v1484_v13 = vld [vmem:[#allocation2 + $0xf28] sm:$0xff] }
 0x583   :  { %1611 = vmatpush2.msra.mxu1 %v1497_v14  ;;  %v1436_v14 = vld [vmem:[#allocation2 + $0xda8] sm:$0xff] }
 0x584   :  { %1612 = vmatprep.subr.mxu1 %v1495_v15  ;;  %v1481_v15 = vld [vmem:[#allocation2 + $0xf10] sm:$0xff] }
 0x585   :  { %1613 = vmatpush2.msra.mxu1 %v1494_v16  ;;  %v1433_v16 = vld [vmem:[#allocation2 + $0xd90] sm:$0xff] }
 0x586   :  { %1614 = vmatprep.subr.mxu1 %v1492_v17  ;;  %v1538_v17 = vld [vmem:[#allocation2 + $0x10d8] sm:$0xff] }
 0x587   :  { %1615 = vmatpush2.msra.mxu1 %v1491_v18  ;;  %v1535_v18 = vld [vmem:[#allocation2 + $0x10c0] sm:$0xff] }
 0x588   :  { %1616 = vmatprep.subr.mxu1 %v1489_v19  ;;  %v1532_v19 = vld [vmem:[#allocation2 + $0x10a8] sm:$0xff] }
 0x589   :  { %1617 = vmatpush2.msra.mxu1 %v1488_v21  ;;  %v1877_v21 = vld [vmem:[#allocation2 + $0x13c8] sm:$0xff] }
 0x58a   :  { %1618 = vmatprep.subr.mxu1 %v1486_v23  ;;  %v1876_v23 = vld [vmem:[#allocation2 + $0x13b0] sm:$0xff] }
 0x58b   :  { %1619 = vmatpush2.msra.mxu1 %v1485_v25  ;;  %v1875_v25 = vld [vmem:[#allocation2 + $0x1398] sm:$0xff] }
 0x58c   :  { %1620 = vmatprep.subr.mxu1 %v1483_v27  ;;  %v1874_v27 = vld [vmem:[#allocation2 + $0x1380] sm:$0xff] }
 0x58d   :  { %1621 = vmatpush2.msra.mxu1 %v1482_v29  ;;  %v1873_v29 = vld [vmem:[#allocation2 + $0x1368] sm:$0xff] }
 0x58e   :  { %1622 = vmatprep.subr.mxu1 %v1480_v30  ;;  %v1857_v30 = vld [vmem:[#allocation2 + $0x11e8] sm:$0xff] }
 0x58f   :  { %1623 = vmatpush2.msra.mxu1 %v1479_v31  ;;  %v1872_v31 = vld [vmem:[#allocation2 + $0x1350] sm:$0xff] }
 0x590   :  { %2553 = vmatprep.subr.mxu1 %v2716_v0 }
 0x610   :  { %v1352_v36 = vpop.f32.mrf.mxu1 }
 0x611   :  { %v1423_v37 = vpop.f32.mrf.mxu0  ;;  %v2902_v40 = vadd.f32 %v1352_v36, %v1271_v34  ;;  %v1855_v34 = vld [vmem:[#allocation2 + $0x11b8] sm:$0xff]  ;;  %v1854_v36 = vld [vmem:[#allocation2 + $0x11a0] sm:$0xff] }
 0x612   :  { %v2900_v38 = vadd.f32 %v1423_v37, %v1279_v33  ;;  %v1354_v39 = vpop.f32.mrf.mxu1  ;;  %v1871_v33 = vld [vmem:[#allocation2 + $0x1338] sm:$0xff]  ;;  %v1869_v37 = vld [vmem:[#allocation2 + $0x1308] sm:$0xff] }
 0x613   :  { %v1355_v41 = vadd.f32 %v1354_v39, %v1275_v35  ;;  %v1425_v42 = vpop.f32.mrf.mxu0  ;;  %v1427_v48 = vmax.f32 %v2902_v40, 0.0  ;;  %v1870_v35 = vld [vmem:[#allocation2 + $0x1320] sm:$0xff]  ;;  %v1868_v39 = vld [vmem:[#allocation2 + $0x12f0] sm:$0xff] }
 0x614   :  { %v1429_v43 = vmax.f32 %v2900_v38, 0.0  ;;  %v1853_v38 = vld [vmem:[#allocation2 + $0x1188] sm:$0xff]  ;;  %v1852_v40 = vld [vmem:[#allocation2 + $0x1170] sm:$0xff]  ;;  %v1851_v42 = vld [vmem:[#allocation2 + $0x1158] sm:$0xff] }
 0x615   :  { %v1428_v45 = vmax.f32 %v1355_v41, 0.0  ;;  %v1867_v41 = vld [vmem:[#allocation2 + $0x12d8] sm:$0xff] }
 0x616   :  { %2335 = vmatmul.mubr.msk.f32.vlgmr.msra.gmra.mxu0 %vm780_vm3, %v1429_v43 }
 0x617   :  { %2398 = vmatpush3.msra.mxu0 %v1478_v44  ;;  %1624 = vmatprep.mubr.f32.mxu1 %v1428_v45  ;;  %v1850_v44 = vld [vmem:[#allocation2 + $0x1140] sm:$0xff] }
 0x618   :  { %2399 = vmatprep.subr.mxu0 %v1523_v46  ;;  %1766 = vmatprep.mubr.f32.mxu0 %v1428_v45  ;;  %v1865_v45 = vld [vmem:[#allocation2 + $0x12a8] sm:$0xff] }
 0x619   :  { %2400 = vmatpush3.msra.mxu0 %v1475_v47  ;;  %1625 = vmatmul.mubr.f32.vlgmr.msra.gmra.mxu1 %v1427_v48  ;;  %v1849_v46 = vld [vmem:[#allocation2 + $0x1128] sm:$0xff]  ;;  %v1864_v47 = vld [vmem:[#allocation2 + $0x1290] sm:$0xff] }
 0x61a   :  { %2401 = vmatprep.subr.mxu0 %v1520_v49  ;;  %2559 = vmatprep.mubr.msk.f32.mxu1 %vm2717_vm0, %v2716_v0  ;;  %v1863_v49 = vld [vmem:[#allocation2 + $0x1278] sm:$0xff] }
 0x61b   :  { %2402 = vmatpush3.msra.mxu0 %v1472_v50  ;;  %v1847_v50 = vld [vmem:[#allocation2 + $0x10f8] sm:$0xff] }
 0x61c   :  { %2403 = vmatprep.subr.mxu0 %v1517_v51  ;;  %v1862_v51 = vld [vmem:[#allocation2 + $0x1260] sm:$0xff] }
 0x61d   :  { %2404 = vmatpush3.msra.mxu0 %v1469_v52  ;;  %v1846_v52 = vld [vmem:[#allocation2 + $0x10e0] sm:$0xff] }
 0x61e   :  { %2405 = vmatprep.subr.mxu0 %v1514_v53  ;;  %v1880_v53 = vld [vmem:[#allocation2 + $0x1410] sm:$0xff] }
 0x61f   :  { %2406 = vmatpush3.msra.mxu0 %v1466_v55  ;;  %2554 = vmatpush3.msra.mxu1 %v1880_v53  ;;  %v1879_v55 = vld [vmem:[#allocation2 + $0x13f8] sm:$0xff] }
 0x620   :  { %2407 = vmatprep.subr.mxu0 %v1511_v58  ;;  %2555 = vmatprep.subr.mxu1 %v2716_v0  ;;  %v1878_v58 = vld [vmem:[#allocation2 + $0x13e0] sm:$0xff]  ;;  %v1881_v53 = vld [vmem:[#allocation7 + $0x7] ss:$0 sm:$0xff] }
 0x621   :  { %2408 = vmatpush3.msra.mxu0 %v1463_v59  ;;  %2556 = vmatpush3.msra.mxu1 %v1879_v55  ;;  %v1540_v59 = vld [vmem:[#allocation7 + $0x6] ss:$8 sm:$0x7] }
 0x622   :  { %2409 = vmatprep.subr.mxu0 %v1508_v60  ;;  %2557 = vmatprep.subr.mxu1 %v2716_v0  ;;  %v1545_v60 = vrot.slane %v1540_v59, %v2790_v56 }
 0x623   :  { %2410 = vmatpush3.msra.mxu0 %v1460_v61  ;;  %2558 = vmatpush3.msra.mxu1 %v1878_v58  ;;  %v1549_v61 = vrot.slane %v1540_v59, %v2792_v57  ;;  %v1553_v57 = vrot.slane %v1540_v59, %v2788_v54  ;;  %v2039_v54 = vld [vmem:[#allocation4 + $0x200] sm:$0xff] }
 0x624   :  { %2411 = vmatprep.subr.mxu0 %v1505_v62  ;;  %2058 = vmatprep.subr.mxu1 %v2716_v0 }
 0x625   :  { %2412 = vmatpush3.msra.mxu0 %v1457_v63 }
 0x626   :  { %2413 = vmatprep.subr.mxu0 %v1502_v1 }
 0x627   :  { %2414 = vmatpush3.msra.mxu0 %v1454_v2 }
 0x628   :  { %2415 = vmatprep.subr.mxu0 %v1499_v3 }
 0x629   :  { %2416 = vmatpush3.msra.mxu0 %v1451_v4 }
 0x62a   :  { %2417 = vmatprep.subr.mxu0 %v1496_v5 }
 0x62b   :  { %2418 = vmatpush3.msra.mxu0 %v1448_v6 }
 0x62c   :  { %2419 = vmatprep.subr.mxu0 %v1493_v7 }
 0x62d   :  { %2420 = vmatpush3.msra.mxu0 %v1445_v8 }
 0x62e   :  { %2421 = vmatprep.subr.mxu0 %v1490_v9 }
 0x62f   :  { %2422 = vmatpush3.msra.mxu0 %v1442_v10 }
 0x630   :  { %2423 = vmatprep.subr.mxu0 %v1487_v11  ;;  %v2933_v11 = vpop.permute.xlu1 %2049 }
 0x631   :  { %2424 = vmatpush3.msra.mxu0 %v1439_v12 }
 0x632   :  { %2425 = vmatprep.subr.mxu0 %v1484_v13 }
 0x633   :  { %2426 = vmatpush3.msra.mxu0 %v1436_v14 }
 0x634   :  { %2427 = vmatprep.subr.mxu0 %v1481_v15 }
 0x635   :  { %2428 = vmatpush3.msra.mxu0 %v1433_v16 }
 0x636   :  { %1767 = vmatmul.mubr.f32.vlgmr.msra.gmra.mxu0 %v1427_v48  ;;  %2542 = vmatprep.subr.mxu0 %v2716_v0  ;;  %v1848_v48 = vld [vmem:[#allocation2 + $0x1110] sm:$0xff] }
 0x637   :  { %2543 = vmatpush3.msra.mxu0 %v1538_v17  ;;  %2550 = vmatprep.mubr.msk.f32.mxu0 %vm2717_vm0, %v2716_v0  ;;  %v2042_v17 = vld [vmem:[#allocation4 + $0x230] sm:$0xff] }
 0x638   :  { %2544 = vmatprep.subr.mxu0 %v2716_v0 }
 0x639   :  { %2545 = vmatpush3.msra.mxu0 %v1535_v18  ;;  %v2052_v18 = vpop.permute.xlu1 %2051 }
 0x63a   :  { %2546 = vmatprep.subr.mxu0 %v2716_v0 }
 0x63b   :  { %2547 = vmatpush3.msra.mxu0 %v1532_v19  ;;  %v2041_v19 = vld [vmem:[#allocation4 + $0x220] sm:$0xff] }
 0x63c   :  { %2548 = vmatprep.subr.mxu0 %v2716_v0 }
 0x63d   :  { %2549 = vmatpush3.msra.mxu0 %v1529_v20  ;;  %v2040_v20 = vld [vmem:[#allocation4 + $0x210] sm:$0xff] }
 0x63e   :  { %2551 = vmatmul.mubr.msk.f32.vlgmr.msra.gmra.mxu0 %vm780_vm3, %v1429_v43  ;;  %2437 = vmatprep.subr.mxu0 %v1877_v21  ;;  %v1866_v43 = vld [vmem:[#allocation2 + $0x12c0] sm:$0xff]  ;;  %v2038_v21 = vld [vmem:[#allocation4 + $0x1f0] sm:$0xff] }
 0x63f   :  { %2438 = vmatpush3.msra.mxu0 %v1861_v22  ;;  %v2037_v22 = vld [vmem:[#allocation4 + $0x1e0] sm:$0xff] }
 0x640   :  { %2439 = vmatprep.subr.mxu0 %v1876_v23  ;;  %v2036_v23 = vld [vmem:[#allocation4 + $0x1d0] sm:$0xff] }
 0x641   :  { %2440 = vmatpush3.msra.mxu0 %v1860_v24  ;;  %v2035_v24 = vld [vmem:[#allocation4 + $0x1c0] sm:$0xff] }
 0x642   :  { %2441 = vmatprep.subr.mxu0 %v1875_v25  ;;  %v2034_v25 = vld [vmem:[#allocation4 + $0x1b0] sm:$0xff] }
 0x643   :  { %2442 = vmatpush3.msra.mxu0 %v1859_v26  ;;  %v2033_v26 = vld [vmem:[#allocation4 + $0x1a0] sm:$0xff] }
 0x644   :  { %2443 = vmatprep.subr.mxu0 %v1874_v27  ;;  %v2032_v27 = vld [vmem:[#allocation4 + $0x190] sm:$0xff] }
 0x645   :  { %2444 = vmatpush3.msra.mxu0 %v1858_v28  ;;  %v2031_v28 = vld [vmem:[#allocation4 + $0x180] sm:$0xff] }
 0x646   :  { %2445 = vmatprep.subr.mxu0 %v1873_v29  ;;  %v2030_v29 = vld [vmem:[#allocation4 + $0x170] sm:$0xff] }
 0x647   :  { %2446 = vmatpush3.msra.mxu0 %v1857_v30  ;;  %v2029_v30 = vld [vmem:[#allocation4 + $0x160] sm:$0xff] }
 0x648   :  { %2447 = vmatprep.subr.mxu0 %v1872_v31  ;;  %v2028_v31 = vld [vmem:[#allocation4 + $0x150] sm:$0xff] }
 0x649   :  { %2448 = vmatpush3.msra.mxu0 %v1856_v32  ;;  %v2027_v32 = vld [vmem:[#allocation4 + $0x140] sm:$0xff] }
 0x64a   :  { %2449 = vmatprep.subr.mxu0 %v1871_v33  ;;  %v2046_v33 = vld [vmem:[#allocation4 + $0x270] sm:$0xff] }
 0x64b   :  { %2450 = vmatpush3.msra.mxu0 %v1855_v34  ;;  %v2045_v34 = vld [vmem:[#allocation4 + $0x260] sm:$0xff] }
 0x64c   :  { %2451 = vmatprep.subr.mxu0 %v1870_v35  ;;  %v2044_v35 = vld [vmem:[#allocation4 + $0x250] sm:$0xff] }
 0x64d   :  { %2452 = vmatpush3.msra.mxu0 %v1854_v36  ;;  %v2043_v36 = vld [vmem:[#allocation4 + $0x240] sm:$0xff] }
 0x64e   :  { %2453 = vmatprep.subr.mxu0 %v1869_v37  ;;  %v2054_v37 = vsel %vm2053_vm8, %v2933_v11, %v2052_v18 }
 0x64f   :  { %2454 = vmatpush3.msra.mxu0 %v1853_v38  ;;  %v2141_v38 = vld [vmem:[#allocation4 + $0x330] sm:$0xff] }
 0x650   :  { %2455 = vmatprep.subr.mxu0 %v1868_v39  ;;  %v2140_v39 = vld [vmem:[#allocation4 + $0x320] sm:$0xff] }
 0x651   :  { %2456 = vmatpush3.msra.mxu0 %v1852_v40  ;;  %v2139_v40 = vld [vmem:[#allocation4 + $0x310] sm:$0xff] }
 0x652   :  { %2457 = vmatprep.subr.mxu0 %v1867_v41  ;;  %v2138_v41 = vld [vmem:[#allocation4 + $0x300] sm:$0xff] }
 0x653   :  { %2458 = vmatpush3.msra.mxu0 %v1851_v42  ;;  %v2137_v42 = vld [vmem:[#allocation4 + $0x2f0] sm:$0xff] }
 0x654   :  { %2459 = vmatprep.subr.mxu0 %v1866_v43  ;;  %v2136_v43 = vld [vmem:[#allocation4 + $0x2e0] sm:$0xff] }
 0x655   :  { %2460 = vmatpush3.msra.mxu0 %v1850_v44  ;;  %v2135_v44 = vld [vmem:[#allocation4 + $0x2d0] sm:$0xff] }
 0x656   :  { %2461 = vmatprep.subr.mxu0 %v1865_v45  ;;  %v2134_v45 = vld [vmem:[#allocation4 + $0x2c0] sm:$0xff] }
 0x657   :  { %2462 = vmatpush3.msra.mxu0 %v1849_v46  ;;  %v2133_v46 = vld [vmem:[#allocation4 + $0x2b0] sm:$0xff] }
 0x658   :  { %2463 = vmatprep.subr.mxu0 %v1864_v47  ;;  %v2132_v47 = vld [vmem:[#allocation4 + $0x2a0] sm:$0xff] }
 0x659   :  { %2464 = vmatpush3.msra.mxu0 %v1848_v48  ;;  %v2131_v48 = vld [vmem:[#allocation4 + $0x290] sm:$0xff] }
 0x65a   :  { %2465 = vmatprep.subr.mxu0 %v1863_v49  ;;  %v2130_v49 = vld [vmem:[#allocation4 + $0x280] sm:$0xff] }
 0x65b   :  { %2466 = vmatpush3.msra.mxu0 %v1847_v50 }
 0x65c   :  { %2467 = vmatprep.subr.mxu0 %v1862_v51 }
 0x65d   :  { %2468 = vmatpush3.msra.mxu0 %v1846_v52 }
 0x65e   :  { %2562 = vmatprep.subr.mxu0 %v2716_v0 }
 0x6d6   :  { %v1697_v62 = vpop.f32.mrf.mxu0 }
 0x6d8   :  { %v1699_v4 = vpop.f32.mrf.mxu0 }
 0x6d9   :  { %v1626_v63 = vpop.f32.mrf.mxu1 }
 0x6da   :  { %v1627_v1 = vadd.f32 %v1626_v63, %v1545_v60 }
 0x6db   :  { %v1628_v2 = vpop.f32.mrf.mxu1 }
 0x6dc   :  { %v1629_v3 = vadd.f32 %v1628_v2, %v1549_v61  ;;  %v1698_v5 = vadd.f32 %v1697_v62, %v1627_v1  ;;  %v2047_v62 = vld [vmem:[#allocation7 + $0x18] ss:$0 sm:$0xff] }
 0x6de   :  { %v1700_v6 = vadd.f32 %v1699_v4, %v1629_v3  ;;  %v1842_v8 = vmax.f32 %v1698_v5, 0.0  ;;  %v2224_v4 = vld [vmem:[#allocation4 + $0x420] sm:$0xff]  ;;  %v2223_v5 = vld [vmem:[#allocation4 + $0x410] sm:$0xff] }
 0x6e0   :  { %v1843_v7 = vmax.f32 %v1700_v6, 0.0  ;;  %v2222_v6 = vld [vmem:[#allocation4 + $0x400] sm:$0xff] }
 0x6e2   :  { %1949 = vmatprep.mubr.f32.mxu0 %v1843_v7  ;;  %v2221_v7 = vld [vmem:[#allocation4 + $0x3f0] sm:$0xff] }
 0x6e3   :  { %1950 = vmatmul.mubr.f32.vlgmr.msra.gmra.mxu0 %v1842_v8  ;;  %v2220_v8 = vld [vmem:[#allocation4 + $0x3e0] sm:$0xff] }
 0x6e4   :  { %2586 = vmatprep.mubr.msk.f32.mxu0 %vm2717_vm0, %v2716_v0  ;;  %2563 = vmatpush3.msra.mxu0 %v2141_v38 }
 0x6e5   :  { %2564 = vmatprep.subr.mxu0 %v2716_v0 }
 0x6e6   :  { %2565 = vmatpush3.msra.mxu0 %v2140_v39 }
 0x6e7   :  { %2566 = vmatprep.subr.mxu0 %v2716_v0 }
 0x6e8   :  { %2567 = vmatpush3.msra.mxu0 %v2139_v40 }
 0x6e9   :  { %2568 = vmatprep.subr.mxu0 %v2716_v0 }
 0x6ea   :  { %2569 = vmatpush3.msra.mxu0 %v2138_v41 }
 0x6eb   :  { %2570 = vmatprep.subr.mxu0 %v2716_v0 }
 0x6ec   :  { %2571 = vmatpush3.msra.mxu0 %v2137_v42 }
 0x6ed   :  { %2572 = vmatprep.subr.mxu0 %v2716_v0 }
 0x6ee   :  { %2573 = vmatpush3.msra.mxu0 %v2136_v43 }
 0x6ef   :  { %2574 = vmatprep.subr.mxu0 %v2716_v0 }
 0x6f0   :  { %2575 = vmatpush3.msra.mxu0 %v2135_v44 }
 0x6f1   :  { %2576 = vmatprep.subr.mxu0 %v2716_v0 }
 0x6f2   :  { %2577 = vmatpush3.msra.mxu0 %v2134_v45 }
 0x6f3   :  { %2578 = vmatprep.subr.mxu0 %v2716_v0 }
 0x6f4   :  { %2579 = vmatpush3.msra.mxu0 %v2133_v46 }
 0x6f5   :  { %2580 = vmatprep.subr.mxu0 %v2716_v0 }
 0x6f6   :  { %v2429_v9 = vpop.f32.mrf.mxu0  ;;  %2581 = vmatpush3.msra.mxu0 %v2132_v47 }
 0x6f7   :  { %2582 = vmatprep.subr.mxu0 %v2716_v0 }
 0x6f8   :  { %v2430_v10 = vpop.f32.mrf.mxu0  ;;  %2583 = vmatpush3.msra.mxu0 %v2131_v48 }
 0x6f9   :  { %v2431_v56 = vadd.f32 %v2430_v10, %v2429_v9  ;;  %2584 = vmatprep.subr.mxu0 %v2716_v0  ;;  %v2219_v9 = vld [vmem:[#allocation4 + $0x3d0] sm:$0xff]  ;;  %v2218_v10 = vld [vmem:[#allocation4 + $0x3c0] sm:$0xff] }
 0x6fa   :  { %2585 = vmatpush3.msra.mxu0 %v2130_v49 }
 0x6fb   :  { %v1769_v12 = vadd.f32 %v2431_v56, %v1553_v57  ;;  %2589 = vmatprep.subr.mxu0 %v2716_v0  ;;  %v2142_v56 = vld [vmem:[#allocation7 + $0x19] ss:$0 sm:$0xff] }
 0x6fe   :  { %v1838_v13 = vpop.f32.mrf.mxu0 }
 0x6ff   :  { %v1839_v14 = vadd.f32 %v1838_v13, %v1769_v12 }
 0x700   :  { %v2552_v15 = vpop.f32.mrf.mxu0 }
 0x701   :  { %v1844_v16 = vmax.f32 %v1839_v14, 0.0  ;;  %v2225_v14 = vld [vmem:[#allocation7 + $0x1a] ss:$0 sm:$0xff] }
 0x703   :  { %2560 = vmatmul.mubr.msk.f32.vlgmr.msra.gmra.mxu1 %vm405_vm2, %v1844_v16 }
 0x704   :  { %2059 = vmatpush1.msra.mxu1 %v2042_v17  ;;  %2338 = vmatprep.mubr.msk.f32.mxu1 %vm780_vm3, %v2052_v18 }
 0x705   :  { %2060 = vmatprep.subr.mxu1 %v2716_v0 }
 0x706   :  { %2061 = vmatpush1.msra.mxu1 %v2041_v19 }
 0x707   :  { %2062 = vmatprep.subr.mxu1 %v2716_v0 }
 0x708   :  { %2063 = vmatpush1.msra.mxu1 %v2040_v20 }
 0x709   :  { %2064 = vmatprep.subr.mxu1 %v2716_v0 }
 0x70a   :  { %2065 = vmatpush1.msra.mxu1 %v2039_v54 }
 0x70b   :  { %2066 = vmatprep.subr.mxu1 %v2716_v0 }
 0x70c   :  { %2067 = vmatpush1.msra.mxu1 %v2038_v21 }
 0x70d   :  { %2068 = vmatprep.subr.mxu1 %v2716_v0 }
 0x70e   :  { %2069 = vmatpush1.msra.mxu1 %v2037_v22 }
 0x70f   :  { %2070 = vmatprep.subr.mxu1 %v2716_v0 }
 0x710   :  { %2071 = vmatpush1.msra.mxu1 %v2036_v23 }
 0x711   :  { %2072 = vmatprep.subr.mxu1 %v2716_v0 }
 0x712   :  { %2073 = vmatpush1.msra.mxu1 %v2035_v24 }
 0x713   :  { %2074 = vmatprep.subr.mxu1 %v2716_v0 }
 0x714   :  { %2075 = vmatpush1.msra.mxu1 %v2034_v25 }
 0x715   :  { %2076 = vmatprep.subr.mxu1 %v2716_v0 }
 0x716   :  { %2077 = vmatpush1.msra.mxu1 %v2033_v26 }
 0x717   :  { %2078 = vmatprep.subr.mxu1 %v2716_v0 }
 0x718   :  { %2079 = vmatpush1.msra.mxu1 %v2032_v27 }
 0x719   :  { %2080 = vmatprep.subr.mxu1 %v2716_v0 }
 0x71a   :  { %2081 = vmatpush1.msra.mxu1 %v2031_v28 }
 0x71b   :  { %2082 = vmatprep.subr.mxu1 %v2716_v0 }
 0x71c   :  { %2083 = vmatpush1.msra.mxu1 %v2030_v29 }
 0x71d   :  { %2084 = vmatprep.subr.mxu1 %v2716_v0 }
 0x71e   :  { %2085 = vmatpush1.msra.mxu1 %v2029_v30 }
 0x71f   :  { %2086 = vmatprep.subr.mxu1 %v2716_v0 }
 0x720   :  { %2087 = vmatpush1.msra.mxu1 %v2028_v31 }
 0x721   :  { %2088 = vmatprep.subr.mxu1 %v2716_v0 }
 0x722   :  { %2089 = vmatpush1.msra.mxu1 %v2027_v32 }
 0x723   :  { %2114 = vmatprep.subr.mxu1 %v2716_v0 }
 0x724   :  { %2115 = vmatpush2.msra.mxu1 %v2046_v33 }
 0x725   :  { %2116 = vmatprep.subr.mxu1 %v2716_v0 }
 0x726   :  { %2117 = vmatpush2.msra.mxu1 %v2045_v34 }
 0x727   :  { %2118 = vmatprep.subr.mxu1 %v2716_v0 }
 0x728   :  { %2119 = vmatpush2.msra.mxu1 %v2044_v35 }
 0x729   :  { %2120 = vmatprep.subr.mxu1 %v2716_v0 }
 0x72a   :  { %2121 = vmatpush2.msra.mxu1 %v2043_v36 }
 0x72b   :  { %2123 = vmatmul.mubr.f32.vlgmr.msra.gmra.mxu1 %v2054_v37 }
 0x7a3   :  { %v2469_v50 = vpop.f32.mrf.mxu0 }
 0x7a5   :  { %v2470_v51 = vpop.f32.mrf.mxu0 }
 0x7a6   :  { %v2471_v52 = vadd.f32 %v2470_v51, %v2469_v50 }
 0x7a8   :  { %v1952_v55 = vadd.f32 %v2471_v52, %v1881_v53 }
 0x7c3   :  { %v2021_v58 = vpop.f32.mrf.mxu1 }
 0x7c4   :  { %v2022_v59 = vadd.f32 %v2021_v58, %v1952_v55 }
 0x7c5   :  { %v2561_v60 = vpop.f32.mrf.mxu1 }
 0x7c6   :  { %v2025_v61 = vmax.f32 %v2022_v59, 0.0 }
 0x7c8   :  { %2301 = vst.msk [vmem:[%s2991_s5] sm:$0xff] %vm133_vm1, %v2025_v61 }
 0x7eb   :  { %v2124_v63 = vpop.f32.mrf.mxu1 }
 0x7ec   :  { %v2125_v1 = vadd.f32 %v2124_v63, %v2047_v62 }
 0x7ed   :  { %v2126_v2 = vpop.f32.mrf.mxu1 }
 0x7ee   :  { %v2128_v3 = vmax.f32 %v2125_v1, 0.0 }
 0x7f0   :  { %2587 = vmatmul.mubr.msk.f32.vlgmr.msra.gmra.mxu0 %vm2053_vm8, %v2128_v3 }
 0x7f1   :  { %2590 = vmatpush3.msra.mxu0 %v2224_v4  ;;  %2603 = vmatprep.mubr.msk.f32.mxu0 %vm2717_vm0, %v2716_v0 }
 0x7f2   :  { %2591 = vmatprep.subr.mxu0 %v2716_v0 }
 0x7f3   :  { %2592 = vmatpush3.msra.mxu0 %v2223_v5 }
 0x7f4   :  { %2593 = vmatprep.subr.mxu0 %v2716_v0 }
 0x7f5   :  { %2594 = vmatpush3.msra.mxu0 %v2222_v6 }
 0x7f6   :  { %2595 = vmatprep.subr.mxu0 %v2716_v0 }
 0x7f7   :  { %2596 = vmatpush3.msra.mxu0 %v2221_v7 }
 0x7f8   :  { %2597 = vmatprep.subr.mxu0 %v2716_v0 }
 0x7f9   :  { %2598 = vmatpush3.msra.mxu0 %v2220_v8 }
 0x7fa   :  { %2599 = vmatprep.subr.mxu0 %v2716_v0 }
 0x7fb   :  { %2600 = vmatpush3.msra.mxu0 %v2219_v9 }
 0x7fc   :  { %2601 = vmatprep.subr.mxu0 %v2716_v0 }
 0x7fd   :  { %2602 = vmatpush3.msra.mxu0 %v2218_v10 }
 0x8b0   :  { %v2212_v57 = vpop.f32.mrf.mxu0 }
 0x8b1   :  { %v2213_v11 = vadd.f32 %v2212_v57, %v2142_v56 }
 0x8b2   :  { %v2588_v12 = vpop.f32.mrf.mxu0 }
 0x8b3   :  { %v2216_v13 = vmax.f32 %v2213_v11, 0.0 }
 0x8b5   :  { %2604 = vmatmul.mubr.msk.f32.vlgmr.msra.gmra.mxu0 %vm2226_vm9, %v2216_v13 }
 0x975   :  { %v2296_v15 = vpop.f32.mrf.mxu0 }
 0x976   :  { %v2297_v16 = vadd.f32 %v2296_v15, %v2225_v14 }
 0x977   :  { %v2605_v17 = vpop.f32.mrf.mxu0 }
 0x978   :  { %v2300_v18 = vmax.f32 %v2297_v16, 0.0 }
 0x97a   :  { %2303 = vrot.lane.b32.xlu1 %v2300_v18, %s2720_s28 }
 0x9ec   :  { %v2304_v19 = vpop.permute.xlu1 %2303 }
 0x9ed   :  { %2307 = vst.msk [vmem:[%s2991_s5] sm:$0xff] %vm2306_vm10, %v2304_v19 }
 0x9ee   :  { %2322 = vsyncpa [#allocation3], 1 }
 0x9ef   :  { %2323 = vsyncpa [#allocation5], 1 }
 0x9f0   :  { %2324 = vsyncpa [#allocation8], 1 }

</bundles_post_ra>
